<compile_context>
chip_gen: v7x
topology: tpu7x:2x2x1
jax: 0.10.0
libtpu: 0.0.40
codegen_flags: <defaults>
</compile_context>

<pallas_src>
import math
import jax
import jax.numpy as jnp
from jax.experimental import pallas as pl
from jax.experimental.pallas import tpu as pltpu


# ----------------------------------------------------------------------------
# Generation-aware configuration
# ----------------------------------------------------------------------------
def _pick_vmem_limit():
    try:
        cap = int(pltpu.get_tpu_info().vmem_capacity_bytes)
        return max(16 << 20, min(cap // 2, 64 << 20))
    except Exception:
        return 32 << 20                      # portable default (fits v7x)


_VMEM_LIMIT_BYTES = _pick_vmem_limit()
_TM_CANDS = (1024, 512, 256, 128) if _VMEM_LIMIT_BYTES >= (48 << 20) \
    else (512, 256, 128)

_SINGLE_SHOT_K = 4608                        # max K in CSPDarkNet (9*512)
_TK_STREAM = 2304


def _round_up(x, m):
    return (x + m - 1) // m * m


def _k_n_padding(K, N):
    """Padded GEMM dims shared by weight packing (init) and the kernel call."""
    Np = _round_up(N, 128)
    Kp = _round_up(K, 128)
    if Kp > _SINGLE_SHOT_K:
        Kp = _round_up(K, _TK_STREAM)
    return Kp, Np


# ----------------------------------------------------------------------------
# Pallas kernels: tiled matmul + bias + Mish (+ optional residual add)
# ----------------------------------------------------------------------------
def _mish(y):
    # mish(y) = y * tanh(softplus(y)) = y * (e^2 + 2e) / (e^2 + 2e + 2),
    # e = exp(y).  Clamp y so e^2 cannot overflow f32; for y > 20 the ratio
    # is 1 to f32 precision anyway.  One EUP exp + one approx reciprocal.
    e = jnp.exp(jnp.minimum(y, 20.0))
    num = e * (e + 2.0)
    return y * (num * pl.reciprocal(num + 2.0, approx=True))


# ---- single K-tile path (no accumulator, 2-D grid) --------------------------
def _conv_mish_kernel_1k(p_ref, w_ref, b_ref, o_ref):
    y = jnp.dot(p_ref[...], w_ref[...], preferred_element_type=jnp.float32)
    y = y + b_ref[...]
    o_ref[...] = _mish(y).astype(o_ref.dtype)


def _conv_mish_res_kernel_1k(p_ref, w_ref, b_ref, r_ref, o_ref):
    y = jnp.dot(p_ref[...], w_ref[...], preferred_element_type=jnp.float32)
    y = y + b_ref[...]
    o_ref[...] = (_mish(y) + r_ref[...].astype(jnp.float32)).astype(o_ref.dtype)


# ---- K-streamed fallback (3-D grid, f32 accumulator scratch) ----------------
def _conv_mish_kernel_stream(p_ref, w_ref, b_ref, o_ref, acc_ref):
    k = pl.program_id(2)

    @pl.when(k == 0)
    def _():
        acc_ref[...] = jnp.zeros_like(acc_ref)

    acc_ref[...] += jnp.dot(p_ref[...], w_ref[...],
                            preferred_element_type=jnp.float32)

    @pl.when(k == pl.num_programs(2) - 1)
    def _():
        y = acc_ref[...] + b_ref[...]
        o_ref[...] = _mish(y).astype(o_ref.dtype)


def _conv_mish_res_kernel_stream(p_ref, w_ref, b_ref, r_ref, o_ref, acc_ref):
    k = pl.program_id(2)

    @pl.when(k == 0)
    def _():
        acc_ref[...] = jnp.zeros_like(acc_ref)

    acc_ref[...] += jnp.dot(p_ref[...], w_ref[...],
                            preferred_element_type=jnp.float32)

    @pl.when(k == pl.num_programs(2) - 1)
    def _():
        y = acc_ref[...] + b_ref[...]
        o_ref[...] = (_mish(y) + r_ref[...].astype(jnp.float32)
                      ).astype(o_ref.dtype)


def fused_conv_matmul(patches, wmat_p, bias_p, n_valid, residual=None):
    """out = mish(patches @ wmat_p + bias_p) [+ residual], bf16 output.

    wmat_p is pre-padded (Kp, Np) bf16 with BN scale folded in; bias_p is
    pre-padded (1, Np) f32.  patches is (M, K) bf16-ish activations.
    """
    M, K = patches.shape
    Kp, Np = wmat_p.shape

    # --- adaptive tile selection -------------------------------------------
    if M <= 128:
        tm = _round_up(max(M, 16), 16)          # tiny late-stage layers
    else:
        cands = sorted((_round_up(M, c) - M, -c) for c in _TM_CANDS)
        tm = -cands[0][1]                       # least padding, largest tile
    Mp = _round_up(M, tm)
    Mi = Mp // tm

    # tn=256 feeds the full 256-wide MXU on v6e/v7x; fall back to 128 when
    # that is the only way to keep >=2 parallel grid blocks (v7x megacore).
    if Np % 256 == 0 and not (Mi == 1 and Np == 256):
        tn = 256
    else:
        tn = 128
    Nj = Np // tn

    single_shot = Kp <= _SINGLE_SHOT_K
    tk = Kp if single_shot else _TK_STREAM
    Kk = Kp // tk

    # --- pad activations (already bf16) -------------------------------------
    p = jnp.pad(patches.astype(jnp.bfloat16), ((0, Mp - M), (0, Kp - K)))
    args = [p, wmat_p, bias_p]

    r = None
    if residual is not None:
        r = jnp.pad(residual.astype(jnp.bfloat16),
                    ((0, Mp - M), (0, Np - n_valid)))

    cost = pl.CostEstimate(
        flops=2 * Mp * Np * Kp,
        transcendentals=2 * Mp * Np,
        bytes_accessed=2 * (Mp * Kp + Kp * Np + Mp * Np)
        + (2 * Mp * Np if residual is not None else 0),
    )
    cparams = pltpu.CompilerParams(
        dimension_semantics=("parallel", "parallel") if single_shot
        else ("parallel", "parallel", "arbitrary"),
        vmem_limit_bytes=_VMEM_LIMIT_BYTES,
    )

    if single_shot:
        # Choose grid order so the operand that would be re-fetched is the
        # cheaper one (keeps W resident across the M sweep for early layers).
        j_outer = Mp * (Nj - 1) <= Np * (Mi - 1)
        if j_outer:
            grid = (Nj, Mi)
            pmap = lambda j, i: (i, 0)
            wmap = lambda j, i: (0, j)
            bmap = lambda j, i: (0, j)
            omap = lambda j, i: (i, j)
        else:
            grid = (Mi, Nj)
            pmap = lambda i, j: (i, 0)
            wmap = lambda i, j: (0, j)
            bmap = lambda i, j: (0, j)
            omap = lambda i, j: (i, j)

        in_specs = [
            pl.BlockSpec((tm, Kp), pmap),
            pl.BlockSpec((Kp, tn), wmap),
            pl.BlockSpec((1, tn), bmap),
        ]
        kernel = _conv_mish_kernel_1k
        if residual is not None:
            in_specs.append(pl.BlockSpec((tm, tn), omap))
            args.append(r)
            kernel = _conv_mish_res_kernel_1k

        out = pl.pallas_call(
            kernel,
            out_shape=jax.ShapeDtypeStruct((Mp, Np), jnp.bfloat16),
            grid_spec=pltpu.PrefetchScalarGridSpec(
                num_scalar_prefetch=0,
                grid=grid,
                in_specs=in_specs,
                out_specs=pl.BlockSpec((tm, tn), omap),
            ),
            compiler_params=cparams,
            cost_estimate=cost,
        )(*args)
    else:
        # ------------------ K-streamed fallback: 3-D grid -------------------
        in_specs = [
            pl.BlockSpec((tm, tk), lambda i, j, k: (i, k)),
            pl.BlockSpec((tk, tn), lambda i, j, k: (k, j)),
            pl.BlockSpec((1, tn), lambda i, j, k: (0, j)),
        ]
        kernel = _conv_mish_kernel_stream
        if residual is not None:
            in_specs.append(pl.BlockSpec((tm, tn), lambda i, j, k: (i, j)))
            args.append(r)
            kernel = _conv_mish_res_kernel_stream

        out = pl.pallas_call(
            kernel,
            out_shape=jax.ShapeDtypeStruct((Mp, Np), jnp.bfloat16),
            grid_spec=pltpu.PrefetchScalarGridSpec(
                num_scalar_prefetch=0,
                grid=(Mi, Nj, Kk),
                in_specs=in_specs,
                out_specs=pl.BlockSpec((tm, tn), lambda i, j, k: (i, j)),
                scratch_shapes=[pltpu.VMEM((tm, tn), jnp.float32)],
            ),
            compiler_params=cparams,
            cost_estimate=cost,
        )(*args)

    return out[:M, :n_valid]


# ----------------------------------------------------------------------------
# BasicConv = Conv2d(k, stride, pad=k//2, no bias) + BN + Mish
# ----------------------------------------------------------------------------
def basic_conv_apply(params, x, residual=None):
    # x: NHWC bf16
    k = params["k"]
    stride = params["stride"]
    cout = params["cout"]
    pad = k // 2
    N, H, W, C = x.shape
    Ho = (H + 2 * pad - k) // stride + 1
    Wo = (W + 2 * pad - k) // stride + 1

    if k == 1 and stride == 1:
        patches = x.reshape(N * H * W, C)
    else:
        xp = jnp.pad(x, ((0, 0), (pad, pad), (pad, pad), (0, 0)))
        pieces = []
        for ih in range(k):
            for iw in range(k):
                pieces.append(
                    xp[:, ih:ih + (Ho - 1) * stride + 1:stride,
                          iw:iw + (Wo - 1) * stride + 1:stride, :])
        # feature order (kh, kw, cin) matches the packed weight matrix
        patches = jnp.stack(pieces, axis=3).reshape(N * Ho * Wo, k * k * C)
        # TODO(synk): fold the kxk taps into the Pallas reduction instead of
        # materializing this k*k im2col buffer in HBM.

    res2d = None
    if residual is not None:
        res2d = residual.reshape(N * Ho * Wo, cout)

    out = fused_conv_matmul(patches, params["wmat"], params["bias"], cout,
                            residual=res2d)
    return out.reshape(N, Ho, Wo, cout)


# ----------------------------------------------------------------------------
# Parameter initialization (deterministic, mirrors the PyTorch __init__)
# ----------------------------------------------------------------------------
class KeyGen:
    def __init__(self, key):
        self.key = key

    def next(self):
        self.key, sub = jax.random.split(self.key)
        return sub


def init_basic_conv(kg, cin, cout, k, stride=1):
    n = k * k * cout
    w = jax.random.normal(kg.next(), (cout, cin, k, k), jnp.float32) \
        * math.sqrt(2.0 / n)
    eps = 1e-5
    gamma = jnp.ones((cout,), jnp.float32)
    beta = jnp.zeros((cout,), jnp.float32)
    rmean = jnp.zeros((cout,), jnp.float32)
    rvar = jnp.ones((cout,), jnp.float32)
    scale = gamma / jnp.sqrt(rvar + eps)
    bias = beta - rmean * scale

    # Pre-pack the GEMM operand once: (kh, kw, cin) feature order, BN scale
    # folded into the output columns, bf16, padded to the kernel's (Kp, Np).
    K = k * k * cin
    wmat = jnp.transpose(w, (2, 3, 1, 0)).reshape(K, cout) * scale[None, :]
    Kp, Np = _k_n_padding(K, cout)
    wmat_p = jnp.pad(wmat, ((0, Kp - K), (0, Np - cout))).astype(jnp.bfloat16)
    bias_p = jnp.pad(bias.reshape(1, -1).astype(jnp.float32),
                     ((0, 0), (0, Np - cout)))
    return dict(wmat=wmat_p, bias=bias_p, stride=stride, k=k,
                cin=cin, cout=cout)


def init_resblock(kg, channels, hidden_channels=None):
    if hidden_channels is None:
        hidden_channels = channels
    return dict(
        c1=init_basic_conv(kg, channels, hidden_channels, 1),
        c2=init_basic_conv(kg, hidden_channels, channels, 3),
    )


def resblock_apply(params, x):
    h = basic_conv_apply(params["c1"], x)
    # residual add fused into the last conv's Pallas epilogue
    return basic_conv_apply(params["c2"], h, residual=x)


def init_resblock_body(kg, cin, cout, num_blocks, first):
    p = dict(first=first)
    p["down"] = init_basic_conv(kg, cin, cout, 3, stride=2)
    if first:
        p["split0"] = init_basic_conv(kg, cout, cout, 1)
        p["split1"] = init_basic_conv(kg, cout, cout, 1)
        p["blocks"] = [init_resblock(kg, cout, cout // 2)]
        p["post"] = init_basic_conv(kg, cout, cout, 1)
        p["concat"] = init_basic_conv(kg, cout * 2, cout, 1)
    else:
        p["split0"] = init_basic_conv(kg, cout, cout // 2, 1)
        p["split1"] = init_basic_conv(kg, cout, cout // 2, 1)
        p["blocks"] = [init_resblock(kg, cout // 2) for _ in range(num_blocks)]
        p["post"] = init_basic_conv(kg, cout // 2, cout // 2, 1)
        p["concat"] = init_basic_conv(kg, cout, cout, 1)
    return p


def resblock_body_apply(params, x):
    x = basic_conv_apply(params["down"], x)
    x0 = basic_conv_apply(params["split0"], x)
    x1 = basic_conv_apply(params["split1"], x)
    for blk in params["blocks"]:
        x1 = resblock_apply(blk, x1)
    x1 = basic_conv_apply(params["post"], x1)
    x = jnp.concatenate([x1, x0], axis=-1)   # torch.cat([x1, x0], dim=1)
    x = basic_conv_apply(params["concat"], x)
    return x


def init_cspdarknet(key, layers):
    kg = KeyGen(key)
    inplanes = 32
    feature_channels = [64, 128, 256, 512, 1024]
    params = dict(conv1=init_basic_conv(kg, 3, inplanes, 3, stride=1))
    stages = []
    in_ch = inplanes
    for i in range(5):
        stages.append(init_resblock_body(kg, in_ch, feature_channels[i],
                                         layers[i], first=(i == 0)))
        in_ch = feature_channels[i]
    params["stages"] = stages
    return params


def cspdarknet_forward(params, x_nchw):
    # NCHW f32 in -> NHWC bf16 internal -> NCHW f32 out
    x = jnp.transpose(x_nchw, (0, 2, 3, 1)).astype(jnp.bfloat16)
    x = basic_conv_apply(params["conv1"], x)
    x = resblock_body_apply(params["stages"][0], x)
    x = resblock_body_apply(params["stages"][1], x)
    out3 = resblock_body_apply(params["stages"][2], x)
    out4 = resblock_body_apply(params["stages"][3], out3)
    out5 = resblock_body_apply(params["stages"][4], out4)
    to_nchw = lambda t: jnp.transpose(t, (0, 3, 1, 2)).astype(jnp.float32)
    return to_nchw(out3), to_nchw(out4), to_nchw(out5)


# ----------------------------------------------------------------------------
if __name__ == "__main__":
    key = jax.random.PRNGKey(0)
    k_param, k_input = jax.random.split(key)

    # small config: one Resblock per stage (layers is a constructor argument)
    layers = [1, 1, 1, 1, 1]
    params = init_cspdarknet(k_param, layers)

    # NCHW input, small spatial size (32 -> out3:4x4, out4:2x2, out5:1x1)
    x = jax.random.normal(k_input, (2, 3, 32, 32), jnp.float32)

    out3, out4, out5 = cspdarknet_forward(params, x)
    jax.block_until_ready((out3, out4, out5))

    assert out3.shape == (2, 256, 4, 4)
    assert out4.shape == (2, 512, 2, 2)
    assert out5.shape == (2, 1024, 1, 1)
    print("KERNEL_OK")
</pallas_src>

<mosaic_0001>
module attributes {stable_mosaic.version = 11 : i64} {
  func.func @_conv_mish_kernel_1k(%arg0: i32, %arg1: i32, %arg2: memref<512x128xbf16, #tpu.memory_space<vmem>>, %arg3: memref<128x128xbf16, #tpu.memory_space<vmem>>, %arg4: memref<1x128xf32, #tpu.memory_space<vmem>>, %arg5: memref<512x128xbf16, #tpu.memory_space<vmem>>) attributes {dimension_semantics = [#tpu.dimension_semantics<parallel>, #tpu.dimension_semantics<parallel>], iteration_bounds = array<i64: 1, 4>, scalar_prefetch = 0 : i64, scratch_operands = 0 : i64, tpu.core_type = #tpu.core_type<tc>, window_params = [{transform_indices = @transform_0, window_bounds = array<i64: 512, 128>}, {transform_indices = @transform_1, window_bounds = array<i64: 128, 128>}, {transform_indices = @transform_2, window_bounds = array<i64: 1, 128>}, {transform_indices = @transform_3, window_bounds = array<i64: 512, 128>}]} {
    %c0 = arith.constant 0 : index
    %c0_0 = arith.constant 0 : index
    %0 = vector.load %arg2[%c0, %c0_0] : memref<512x128xbf16, #tpu.memory_space<vmem>>, vector<512x128xbf16>
    %c0_1 = arith.constant 0 : index
    %c0_2 = arith.constant 0 : index
    %1 = vector.load %arg3[%c0_1, %c0_2] : memref<128x128xbf16, #tpu.memory_space<vmem>>, vector<128x128xbf16>
    %cst = arith.constant dense<0.000000e+00> : vector<512x128xf32>
    %2 = tpu.matmul %0, %1, %cst {dimension_numbers = #tpu.dot_dimension_numbers<[1], [0], [0], [1], [0, 0, 1, 1], [], []>} : vector<512x128xbf16>, vector<128x128xbf16>, vector<512x128xf32> -> vector<512x128xf32>
    %c0_3 = arith.constant 0 : index
    %c0_4 = arith.constant 0 : index
    %3 = vector.load %arg4[%c0_3, %c0_4] : memref<1x128xf32, #tpu.memory_space<vmem>>, vector<1x128xf32>
    %4 = vector.broadcast %3 : vector<1x128xf32> to vector<512x128xf32>
    %5 = arith.addf %2, %4 : vector<512x128xf32>
    %cst_5 = arith.constant 2.000000e+01 : f32
    %6 = vector.broadcast %cst_5 : f32 to vector<512x128xf32>
    %7 = arith.minimumf %5, %6 : vector<512x128xf32>
    %8 = math.exp %7 : vector<512x128xf32>
    %cst_6 = arith.constant 2.000000e+00 : f32
    %9 = vector.broadcast %cst_6 : f32 to vector<512x128xf32>
    %10 = arith.addf %8, %9 : vector<512x128xf32>
    %11 = arith.mulf %8, %10 : vector<512x128xf32>
    %cst_7 = arith.constant 2.000000e+00 : f32
    %12 = vector.broadcast %cst_7 : f32 to vector<512x128xf32>
    %13 = arith.addf %11, %12 : vector<512x128xf32>
    %14 = tpu.reciprocal %13 {approx = true} : vector<512x128xf32> -> vector<512x128xf32>
    %15 = arith.mulf %11, %14 : vector<512x128xf32>
    %16 = arith.mulf %5, %15 : vector<512x128xf32>
    %17 = arith.truncf %16 : vector<512x128xf32> to vector<512x128xbf16>
    %c0_8 = arith.constant 0 : index
    %c0_9 = arith.constant 0 : index
    %18 = vector.load %arg5[%c0_8, %c0_9] : memref<512x128xbf16, #tpu.memory_space<vmem>>, vector<512x128xbf16>
    tpu.vector_store %arg5[%c0_8, %c0_9], %17 {strides = array<i32>} : memref<512x128xbf16, #tpu.memory_space<vmem>>, vector<512x128xbf16>,
    return
  }
  func.func @transform_0(%arg0: i32, %arg1: i32) -> (i32, i32) {
    %c0_i32 = arith.constant 0 : i32
    %c0_i32_0 = arith.constant 0 : i32
    return %arg1, %c0_i32 : i32, i32
  }
  func.func @transform_1(%arg0: i32, %arg1: i32) -> (i32, i32) {
    %c0_i32 = arith.constant 0 : i32
    %c0_i32_0 = arith.constant 0 : i32
    return %c0_i32, %arg0 : i32, i32
  }
  func.func @transform_2(%arg0: i32, %arg1: i32) -> (i32, i32) {
    %c0_i32 = arith.constant 0 : i32
    %c0_i32_0 = arith.constant 0 : i32
    return %c0_i32, %arg0 : i32, i32
  }
  func.func @transform_3(%arg0: i32, %arg1: i32) -> (i32, i32) {
    %c0_i32 = arith.constant 0 : i32
    return %arg1, %arg0 : i32, i32
  }
}

</mosaic_0001>

<bundles_post_ra>
// kernel: tpu_custom_call.1
= control target key start
LH: loop header
LB: loop body
LE: loop exit
PB: predicated region body
PF: predicated region fallthrough
CT: control target
= control target key end

     0   :  { %8 = vsyncpa [#allocation3], 0  ;;  %s3943_s0 = inlined_call_operand.hbm [shape: bf16[2048,128], index: 0, kind: input, shape index: {}]   ;;  %s3944_s1 = inlined_call_operand.hbm [shape: bf16[128,128], index: 1, kind: input, shape index: {}]   ;;  %s3945_s2 = inlined_call_operand.vmem [shape: f32[1,128], index: 2, kind: input, shape index: {}]   ;;  %s3946_s3 = inlined_call_operand.hbm [shape: bf16[2048,128], index: 3, kind: output, shape index: {}]  }
   0x1   :  { %10 = vsyncpa [#allocation3 + $0x1], 0 }
   0x2   :  { %11 = vsyncpa [#allocation6], 0 }
   0x3   :  { %12 = vsyncpa [#allocation4], 0 }
   0x4   :  { %14 = vsyncpa [#allocation4 + $0x1], 0  ;;  %s2939_s12 = smov 0   ;;  %s2941_s13 = smov 0  }
   0x5   :  { %s2943_s14 = smov 0   ;;  %s2945_s15 = smov 0  }
   0x6   :  { %s2947_s16 = smov 0   ;;  %s2949_s17 = smov 0  }
   0x7 LB: > { %s1876_s18 = sadd.s32 4294967295, %s2910_s17   ;;  %s1877_s19 = sadd.s32 4294967294, %s2910_s17   ;;  %s2910_s17 = sphi %s2949_s17, %s20_s17   ;;  %s2906_s16 = sphi %s2947_s16, %s4007_s16   ;;  %s2902_s15 = sphi %s2945_s15, %s4006_s15   ;;  %s2898_s14 = sphi %s2943_s14, %s4005_s14   ;;  %s2894_s13 = sphi %s2941_s13, %s4004_s13   ;;  %s2890_s12 = sphi %s2939_s12, %s4003_s12  }
   0x8   : > { %p52_p0 = scmp.ne.s32.totalorder %s2894_s13, %s2890_s12  ;;  %p2973_p1 = scmp.eq.s32.totalorder %s1876_s18, 0 }
   0x9   : > { %p2977_p2 = scmp.eq.s32.totalorder %s1876_s18, 3  ;;  %p136_p3 = scmp.eq.s32.totalorder %s1877_s19, 3 }
   0xa   : > { %s3952_s20 = scalar_select %p2973_p1, 1, 0 }
   0xb   : > { %s3953_s21 = scalar_select %p2977_p2, 1, 0 }
   0xc   : > { %p2983_p4 = por %p2973_p1, %p52_p0  ;;  %p1878_p5 = scmp.ge.s32.totalorder %s2910_s17, 1 }
   0xd   : > { %p2988_p6 = por %p136_p3, %p52_p0  ;;  %p143_p7 = scmp.lt.s32.totalorder %s2910_s17, 5 }
   0xe   : > { %s3954_s22 = scalar_select %p2983_p4, 1, 0 }
   0xf   : > { %s3955_s23 = scalar_select %p2988_p6, 1, 0 }
  0x10   : > { %p2993_p8 = pnand %p1878_p5, %p143_p7  ;;  %s2912_s25 = smov [#allocation5]  }
  0x11   : > { %s157_s26 = sshll.u32 %s2912_s25, 4  ;;  %s29_s28 = sadd.s32 1, %s2906_s16  ;;  %s158_s26 = int_to_ptr.vmem [resolvable:$true] %s157_s26 }
  0x12   : > { %s3956_s24 = scalar_select %p2993_p8, 1, 0 }
  0x13   : > { %p2400_p9 = pneg %p2993_p8  ;;  %s2766_s4 = scalar_lea.hbm %s3944_s1, 1024 }
  0x14   : > { %p2767_p11 = scmp.ne.s32.totalorder %s3944_s1, %s2766_s4  ;;  %p2773_p3 = scmp.lt.u32.totalorder %s2766_s4, %s3944_s1 }
  0x15   : > { %p3001_p10 = pnand %p2400_p9, %p2973_p1 }
  0x17   : > { %p2768_p12 = pneg %p3001_p10 }
  0x19   : > { %p2769_p13 = pnand %p2768_p12, %p2767_p11 }
  0x1b   : > { %p2770_p0 = pneg %p2769_p13 }
  0x1d   : > { %p2775_p5 = pnand %p2773_p3, %p2770_p0 }
  0x1f   : > { %2778 = shalt.err (!%p2775_p5)
}
  0x20   : > { %s2779_s9 = scalar_lea.vmem %s158_s26, 1024  ;;  %p2787_p1 = scmp.lt.s32.totalorder %s158_s26, %s158_s26 }
  0x21   : > { %p2780_p7 = scmp.ne.s32.totalorder %s158_s26, %s2779_s9  ;;  %p2788_p4 = scmp.lt.s32.totalorder %s2779_s9, %s2779_s9 }
  0x23   : > { %p2782_p9 = pnand %p2780_p7, %p2768_p12  ;;  %p2789_p8 = por %p2788_p4, %p2787_p1 }
  0x25   : > { %p2783_p6 = pneg %p2782_p9 }
  0x27   : > { %p2790_p2 = pnand %p2789_p8, %p2783_p6 }
  0x29   : > { %2793 = shalt.err (!%p2790_p2)
}
  0x2a   : > { %s2913_s10 = smov 64   ;;  %s2914_s11 = smov 4  }
  0x2b   : > { %2403 = dma.hbm_to_vmem [thread:$0]  (!%p3001_p10), %s3944_s1, 1024, %s158_s26, [#allocation6], %s2913_s10, %s2913_s10, %s2914_s11  }
  0x2c   : > { %p30_p1 = scmp.ge.s32.totalorder %s29_s28, 4  ;;  %s39_s25 = sadd.s32 1, %s2898_s14 }
  0x2d   : > { %p46_p2 = scmp.ne.s32.totalorder %s2898_s14, %s2894_s13  ;;  %p47_p4 = scmp.eq.s32.totalorder %s2910_s17, 0 }
  0x2e   : > { %s4009_s28 = smov (%p30_p1, %s29_s28), 0  ;;  %p3959_p8 = scmp.ne.s32.totalorder %s3953_s21, 0 }
  0x2f   : > { %p3031_p6 = por %p47_p4, %p46_p2  ;;  %s36_s30 = ssub.s32 %s2906_s16, %s4009_s28 }
  0x30   : > { %p3037_p11 = por %p3959_p8, %p46_p2  ;;  %p2413_p12 = scmp.lt.s32.totalorder %s2910_s17, 4 }
  0x31   : > { %p37_p10 = scmp.eq.s32.totalorder %s36_s30, 0  ;;  %s177_s26 = sand.u32 1, %s2898_s14  }
  0x32   : > { %s1882_s4 = sshll.u32 %s177_s26, 8  ;;  %s1999_s6 = sshll.u32 %s2906_s16, 12 }
  0x33   : > { %s3046_s5 = scalar_select %p37_p10, %s2898_s14, %s39_s25  }
  0x34   : > { %s3052_s9 = scalar_lea.hbm %s3943_s0, %s1999_s6  ;;  %s181_s21 = scalar_lea.vmem [#allocation2], %s1882_s4 }
  0x35   : > { %s188_s18 = sshll.u32 %s181_s21, 4  ;;  %p3058_p13 = pnand %p2413_p12, %p3031_p6  ;;  %s3054_s18 = int_to_ptr.vmem [resolvable:$true] %s188_s18 }
  0x36   : > { %s3062_s25 = scalar_lea.sflag [#allocation3], %s177_s26  ;;  %s2794_s30 = scalar_lea.hbm %s3052_s9, 4096 }
  0x37   : > { %p2795_p0 = scmp.ne.s32.totalorder %s3052_s9, %s2794_s30  ;;  %p2796_p3 = pneg %p3058_p13 }
  0x38   : > { %s2799_s29 = scalar_lea.hbm %s3943_s0, 16384  ;;  %p2800_p9 = scmp.lt.u32.totalorder %s3052_s9, %s3943_s0 }
  0x39   : > { %p2797_p5 = pnand %p2796_p3, %p2795_p0  ;;  %p2801_p1 = scmp.lt.u32.totalorder %s2799_s29, %s2794_s30 }
  0x3a   : > { %p2803_p4 = scmp.lt.u32.totalorder %s2794_s30, %s3052_s9 }
  0x3b   : > { %p2798_p7 = pneg %p2797_p5  ;;  %p2802_p2 = por %p2801_p1, %p2800_p9 }
  0x3d   : > { %p2804_p6 = por %p2803_p4, %p2802_p2 }
  0x3f   : > { %p2805_p8 = pnand %p2804_p6, %p2798_p7 }
  0x41   : > { %2808 = shalt.err (!%p2805_p8)
}
  0x42   : > { %s2809_s26 = scalar_lea.vmem %s3054_s18, 4096  ;;  %s2915_s21 = smov [#allocation2]  }
  0x43   : > { %p2810_p12 = scmp.ne.s32.totalorder %s3054_s18, %s2809_s26  ;;  %s2814_s4 = sshll.u32 %s2915_s21, 4  ;;  %s2815_s4 = int_to_ptr.vmem [resolvable:$false] %s2814_s4 }
  0x44   : > { %s2816_s6 = scalar_lea.vmem %s2815_s4, 8192  ;;  %p2817_p5 = scmp.lt.s32.totalorder %s3054_s18, %s2815_s4 }
  0x45   : > { %p2812_p10 = pnand %p2810_p12, %p2796_p3  ;;  %p2818_p9 = scmp.lt.s32.totalorder %s2816_s6, %s2809_s26 }
  0x47   : > { %p2813_p0 = pneg %p2812_p10  ;;  %p2819_p1 = por %p2818_p9, %p2817_p5 }
  0x49   : > { %p2820_p2 = pnand %p2819_p1, %p2813_p0 }
  0x4b   : > { %2823 = shalt.err (!%p2820_p2)
}
  0x4c   : > { %2407 = dma.hbm_to_vmem [thread:$0]  (!%p3058_p13), %s3052_s9, 4096, %s3054_s18, %s3062_s25, %s2913_s10, %s2913_s10, %s2914_s11  }
  0x4d   : > { %p3962_p3 = scmp.ne.s32.totalorder %s3956_s24, 0 }
  0x4f   : > { %200 = sbr.rel (%p3962_p3) target bundleno = 547 (0x223), region = 32 }
  0x56   : > { %s3096_s30 = sand.u32 1, %s2894_s13   ;;  %p3963_p7 = scmp.ne.s32.totalorder %s3954_s22, 0 }
  0x57   : > { %s1886_s29 = sshll.u32 %s3096_s30, 8  ;;  %s203_s7 = scalar_lea.sflag [#allocation3], %s3096_s30 }
  0x58   : > { %s3102_s19 = scalar_lea.vmem [#allocation2], %s1886_s29 }
  0x59   : > { %2877 = dma.done.wait (%p3963_p7), %s203_s7, 4096  }
  0x5a   : > { %2879 = vsyncadd (%p3963_p7), %s203_s7, 4294963200  ;;  %p3964_p13 = scmp.ne.s32.totalorder %s3952_s20, 0 }
  0x5c   : > { %2881 = dma.done.wait (%p3964_p13), [#allocation6], 1024  }
  0x5d   : > { %2883 = vsyncadd (%p3964_p13), [#allocation6], 4294966272  ;;  %v2469_v0 = vld [vmem:[#allocation5] sm:$0xff]   ;;  %v2470_v1 = vld [vmem:[#allocation5 + $0x8] sm:$0xff]   ;;  %s3366_s24 = scalar_lea.vmem [#allocation7], %s1886_s29  ;;  %s2064_s9 = sshll.u32 %s2902_s15, 12 }
  0x5e   : > { %2296 = vmatprep.subr.bf16.mxu0 %v2469_v0  ;;  %2376 = vmatprep.subr.bf16.mxu1 %v2469_v0  ;;  %v2471_v2 = vld [vmem:[#allocation5 + $0x10] sm:$0xff]   ;;  %v2472_v3 = vld [vmem:[#allocation5 + $0x18] sm:$0xff]   ;;  %v2477_v4 = vld [vmem:[%s3102_s19] sm:$0xff]   ;;  %s1769_s18 = sshll.u32 %s3366_s24, 4  ;;  %s3891_s26 = scalar_lea.hbm %s3946_s3, %s2064_s9  ;;  %s3893_s18 = int_to_ptr.vmem [resolvable:$true] %s1769_s18 }
  0x5f   : > { %2297 = vmatpush3.bf16.msra.mxu0 %v2469_v0  ;;  %2384 = vmatpush3.bf16.msra.mxu1 %v2469_v0  ;;  %v2478_v5 = vld [vmem:[%s3102_s19 + $0x80] sm:$0xff]   ;;  %v2474_v7 = vld [vmem:[#allocation5 + $0x28] sm:$0xff]   ;;  %v2475_v8 = vld [vmem:[#allocation5 + $0x30] sm:$0xff]   ;;  %s1755_s15 = scalar_lea.sflag [#allocation4], %s3096_s30  ;;  %s2824_s21 = scalar_lea.vmem %s3893_s18, 4096 }
  0x60   : > { %2298 = vmatprep.subr.bf16.mxu0 %v2470_v1  ;;  %2377 = vmatprep.subr.bf16.mxu1 %v2470_v1  ;;  %v2473_v6 = vld [vmem:[#allocation5 + $0x20] sm:$0xff]   ;;  %v2476_v9 = vld [vmem:[#allocation5 + $0x38] sm:$0xff]   ;;  %v2479_v10 = vld [vmem:[%s3102_s19 + $0x8] sm:$0xff]   ;;  %p2825_p4 = scmp.ne.s32.totalorder %s3893_s18, %s2824_s21  ;;  %s2916_s4 = smov [#allocation7]  }
  0x61   : > { %2312 = vmatprep.mubr.bf16.mxu0 %v2477_v4  ;;  %2344 = vmatprep.mubr.bf16.mxu1 %v2478_v5  ;;  %v2480_v11 = vld [vmem:[%s3102_s19 + $0x88] sm:$0xff]   ;;  %v2481_v12 = vld [vmem:[%s3102_s19 + $0x10] sm:$0xff]   ;;  %v2483_v14 = vld [vmem:[%s3102_s19 + $0x18] sm:$0xff]   ;;  %s2828_s6 = sshll.u32 %s2916_s4, 4  ;;  %s2829_s6 = int_to_ptr.vmem [resolvable:$false] %s2828_s6 }
  0x62   : > { %v2482_v13 = vld [vmem:[%s3102_s19 + $0x90] sm:$0xff]   ;;  %v2484_v15 = vld [vmem:[%s3102_s19 + $0x98] sm:$0xff]   ;;  %v2485_v16 = vld [vmem:[%s3102_s19 + $0x20] sm:$0xff]   ;;  %p2826_p6 = pnand %p2825_p4, %p3037_p11  ;;  %s2830_s29 = scalar_lea.vmem %s2829_s6, 8192 }
  0x63   : > { %2299 = vmatpush3.bf16.msra.mxu0 %v2470_v1  ;;  %2385 = vmatpush3.bf16.msra.mxu1 %v2470_v1  ;;  %v2486_v17 = vld [vmem:[%s3102_s19 + $0xa0] sm:$0xff]   ;;  %v2487_v18 = vld [vmem:[%s3102_s19 + $0x28] sm:$0xff]   ;;  %v2489_v20 = vld [vmem:[%s3102_s19 + $0x30] sm:$0xff]   ;;  %p2831_p12 = scmp.lt.s32.totalorder %s3893_s18, %s2829_s6  ;;  %p2832_p10 = scmp.lt.s32.totalorder %s2830_s29, %s2824_s21 }
  0x64   : > { %2300 = vmatprep.subr.bf16.mxu0 %v2471_v2  ;;  %2378 = vmatprep.subr.bf16.mxu1 %v2471_v2  ;;  %v2488_v19 = vld [vmem:[%s3102_s19 + $0xa8] sm:$0xff]   ;;  %v2490_v21 = vld [vmem:[%s3102_s19 + $0xb0] sm:$0xff]   ;;  %v2491_v22 = vld [vmem:[%s3102_s19 + $0x38] sm:$0xff]   ;;  %p2827_p8 = pneg %p2826_p6 }
  0x65   : > { %v2492_v23 = vld [vmem:[%s3102_s19 + $0xb8] sm:$0xff]   ;;  %v2493_v24 = vld [vmem:[%s3102_s19 + $0x40] sm:$0xff]   ;;  %v2495_v26 = vld [vmem:[%s3102_s19 + $0x48] sm:$0xff]   ;;  %p2833_p0 = por %p2832_p10, %p2831_p12 }
  0x66   : > { %v2494_v25 = vld [vmem:[%s3102_s19 + $0xc0] sm:$0xff]   ;;  %v2496_v27 = vld [vmem:[%s3102_s19 + $0xc8] sm:$0xff]   ;;  %v2497_v28 = vld [vmem:[%s3102_s19 + $0x50] sm:$0xff]  }
  0x67   : > { %2301 = vmatpush3.bf16.msra.mxu0 %v2471_v2  ;;  %2386 = vmatpush3.bf16.msra.mxu1 %v2471_v2  ;;  %v2498_v29 = vld [vmem:[%s3102_s19 + $0xd0] sm:$0xff]   ;;  %v2499_v30 = vld [vmem:[%s3102_s19 + $0x58] sm:$0xff]   ;;  %v2501_v32 = vld [vmem:[%s3102_s19 + $0x60] sm:$0xff]   ;;  %p2834_p5 = pnand %p2833_p0, %p2827_p8 }
  0x68   : > { %2302 = vmatprep.subr.bf16.mxu0 %v2472_v3  ;;  %2379 = vmatprep.subr.bf16.mxu1 %v2472_v3  ;;  %v2500_v31 = vld [vmem:[%s3102_s19 + $0xd8] sm:$0xff]   ;;  %v2502_v33 = vld [vmem:[%s3102_s19 + $0xe0] sm:$0xff]   ;;  %v2503_v34 = vld [vmem:[%s3102_s19 + $0x68] sm:$0xff]  }
  0x69   : > { %v2504_v35 = vld [vmem:[%s3102_s19 + $0xe8] sm:$0xff]   ;;  %v2505_v36 = vld [vmem:[%s3102_s19 + $0x70] sm:$0xff]   ;;  %v2507_v38 = vld [vmem:[%s3102_s19 + $0x78] sm:$0xff]  }
  0x6a   : > { %v2506_v37 = vld [vmem:[%s3102_s19 + $0xf0] sm:$0xff]   ;;  %v2508_v39 = vld [vmem:[%s3102_s19 + $0xf8] sm:$0xff]   ;;  %v3147_v40 = vld [vmem:[%s3945_s2] ss:$0 sm:$0xff] }
  0x6b   : > { %2303 = vmatpush3.bf16.msra.mxu0 %v2472_v3  ;;  %2387 = vmatpush3.bf16.msra.mxu1 %v2472_v3 }
  0x6c   : > { %2304 = vmatprep.subr.bf16.mxu0 %v2473_v6  ;;  %2380 = vmatprep.subr.bf16.mxu1 %v2473_v6 }
  0x6f   : > { %2305 = vmatpush3.bf16.msra.mxu0 %v2473_v6  ;;  %2388 = vmatpush3.bf16.msra.mxu1 %v2473_v6 }
  0x70   : > { %2306 = vmatprep.subr.bf16.mxu0 %v2474_v7  ;;  %2381 = vmatprep.subr.bf16.mxu1 %v2474_v7 }
  0x73   : > { %2307 = vmatpush3.bf16.msra.mxu0 %v2474_v7  ;;  %2389 = vmatpush3.bf16.msra.mxu1 %v2474_v7 }
  0x74   : > { %2308 = vmatprep.subr.bf16.mxu0 %v2475_v8  ;;  %2382 = vmatprep.subr.bf16.mxu1 %v2475_v8 }
  0x77   : > { %2309 = vmatpush3.bf16.msra.mxu0 %v2475_v8  ;;  %2390 = vmatpush3.bf16.msra.mxu1 %v2475_v8 }
  0x78   : > { %2310 = vmatprep.subr.bf16.mxu0 %v2476_v9  ;;  %2383 = vmatprep.subr.bf16.mxu1 %v2476_v9 }
  0x7b   : > { %2311 = vmatpush3.bf16.msra.mxu0 %v2476_v9  ;;  %2391 = vmatpush3.bf16.msra.mxu1 %v2476_v9 }
  0x7e   : > { %2313 = vmatmul.mubr.bf16.vlgmr.msra.gmra.mrb[0].mxu0 %v2479_v10  ;;  %2345 = vmatmul.mubr.bf16.vlgmr.msra.gmra.mrb[0].mxu1 %v2480_v11 }
  0x7f   : > { %2316 = vmatprep.mubr.bf16.mxu0 %v2481_v12  ;;  %2348 = vmatprep.mubr.bf16.mxu1 %v2482_v13 }
  0x86   : > { %2317 = vmatmul.mubr.bf16.gmra.mrb[4].mxu0 %v2483_v14  ;;  %2349 = vmatmul.mubr.bf16.gmra.mrb[4].mxu1 %v2484_v15 }
  0x87   : > { %2320 = vmatprep.mubr.bf16.mxu0 %v2485_v16  ;;  %2352 = vmatprep.mubr.bf16.mxu1 %v2486_v17 }
  0x8e   : > { %2321 = vmatmul.mubr.bf16.gmra.mrb[8].mxu0 %v2487_v18  ;;  %2353 = vmatmul.mubr.bf16.gmra.mrb[8].mxu1 %v2488_v19 }
  0x8f   : > { %2324 = vmatprep.mubr.bf16.mxu0 %v2489_v20  ;;  %2356 = vmatprep.mubr.bf16.mxu1 %v2490_v21 }
  0x96   : > { %2325 = vmatmul.mubr.bf16.gmra.mrb[12].mxu0 %v2491_v22  ;;  %2357 = vmatmul.mubr.bf16.gmra.mrb[12].mxu1 %v2492_v23 }
  0x97   : > { %2328 = vmatprep.mubr.bf16.mxu0 %v2493_v24  ;;  %2360 = vmatprep.mubr.bf16.mxu1 %v2494_v25 }
  0x9e   : > { %2329 = vmatmul.mubr.bf16.gmra.mrb[16].mxu0 %v2495_v26  ;;  %2361 = vmatmul.mubr.bf16.gmra.mrb[16].mxu1 %v2496_v27 }
  0x9f   : > { %2332 = vmatprep.mubr.bf16.mxu0 %v2497_v28  ;;  %2364 = vmatprep.mubr.bf16.mxu1 %v2498_v29 }
  0xa6   : > { %2333 = vmatmul.mubr.bf16.gmra.mrb[20].mxu0 %v2499_v30  ;;  %2365 = vmatmul.mubr.bf16.gmra.mrb[20].mxu1 %v2500_v31 }
  0xa7   : > { %2336 = vmatprep.mubr.bf16.mxu0 %v2501_v32  ;;  %2368 = vmatprep.mubr.bf16.mxu1 %v2502_v33 }
  0xae   : > { %2337 = vmatmul.mubr.bf16.gmra.mrb[24].mxu0 %v2503_v34  ;;  %2369 = vmatmul.mubr.bf16.gmra.mrb[24].mxu1 %v2504_v35 }
  0xaf   : > { %2340 = vmatprep.mubr.bf16.mxu0 %v2505_v36  ;;  %2372 = vmatprep.mubr.bf16.mxu1 %v2506_v37 }
  0xb6   : > { %2341 = vmatmul.mubr.bf16.gmra.mrb[28].mxu0 %v2507_v38  ;;  %2373 = vmatmul.mubr.bf16.gmra.mrb[28].mxu1 %v2508_v39 }
 0x151   : > { %v2314_v41 = vpop.f32.mrb[0].mxu0  ;;  %v2346_v42 = vpop.f32.mrb[0].mxu1 }
 0x152   : > { %v3150_v43 = vadd.f32 %v2314_v41, %v3147_v40  ;;  %v3153_v44 = vadd.f32 %v2346_v42, %v3147_v40  ;;  %v603_v45 = vpop.f32.mrb[1].mxu0  ;;  %v731_v46 = vpop.f32.mrb[1].mxu1 }
 0x153   : > { %v3156_v47 = vadd.f32 %v3147_v40, %v603_v45  ;;  %v3159_v48 = vadd.f32 %v3147_v40, %v731_v46  ;;  %v2315_v49 = vpop.f32.mrb[2].mxu0  ;;  %v2347_v50 = vpop.f32.mrb[2].mxu1 }
 0x154   : > { %v860_v51 = vmin.f32 %v3150_v43, 20.0  ;;  %v892_v52 = vmin.f32 %v3153_v44, 20.0  ;;  %v3164_v53 = vadd.f32 %v2315_v49, %v3147_v40  ;;  %v3167_v54 = vadd.f32 %v2347_v50, %v3147_v40  ;;  %v606_v55 = vpop.f32.mrb[3].mxu0  ;;  %v734_v56 = vpop.f32.mrb[3].mxu1 }
 0x155   : > { %v858_v57 = vmin.f32 %v3156_v47, 20.0  ;;  %v890_v58 = vmin.f32 %v3159_v48, 20.0  ;;  %v3172_v59 = vadd.f32 %v3147_v40, %v606_v55  ;;  %v3175_v60 = vadd.f32 %v3147_v40, %v734_v56 }
 0x156   : > { %v926_v61 = vmul.f32 1.442695, %v860_v51  ;;  %v990_v62 = vmul.f32 1.442695, %v892_v52  ;;  %v861_v63 = vmin.f32 %v3164_v53, 20.0  ;;  %v893_v0 = vmin.f32 %v3167_v54, 20.0 }
 0x157   : > { %v922_v1 = vmul.f32 1.442695, %v858_v57  ;;  %v986_v2 = vmul.f32 1.442695, %v890_v58  ;;  %v859_v3 = vmin.f32 %v3172_v59, 20.0  ;;  %v891_v4 = vmin.f32 %v3175_v60, 20.0 }
 0x158   : > { %2509 = vpow2.f32 %v926_v61  ;;  %v928_v5 = vmul.f32 1.442695, %v861_v63  ;;  %v992_v6 = vmul.f32 1.442695, %v893_v0 }
 0x159   : > { %2511 = vpow2.f32 %v990_v62  ;;  %v2318_v7 = vpop.f32.mrb[4].mxu0  ;;  %v2350_v8 = vpop.f32.mrb[4].mxu1  ;;  %v924_v9 = vmul.f32 1.442695, %v859_v3  ;;  %v988_v14 = vmul.f32 1.442695, %v891_v4 }
 0x15a   : > { %2513 = vpow2.f32 %v922_v1  ;;  %v3182_v10 = vadd.f32 %v2318_v7, %v3147_v40  ;;  %v3185_v11 = vadd.f32 %v2350_v8, %v3147_v40  ;;  %v619_v12 = vpop.f32.mrb[5].mxu0  ;;  %v747_v13 = vpop.f32.mrb[5].mxu1 }
 0x15b   : > { %2515 = vpow2.f32 %v986_v2  ;;  %v3188_v15 = vadd.f32 %v3147_v40, %v619_v12  ;;  %v3191_v16 = vadd.f32 %v3147_v40, %v747_v13  ;;  %v2319_v17 = vpop.f32.mrb[6].mxu0  ;;  %v2351_v18 = vpop.f32.mrb[6].mxu1 }
 0x15c   : > { %2517 = vpow2.f32 %v928_v5  ;;  %v864_v19 = vmin.f32 %v3182_v10, 20.0  ;;  %v896_v20 = vmin.f32 %v3185_v11, 20.0  ;;  %v3196_v21 = vadd.f32 %v2319_v17, %v3147_v40  ;;  %v622_v22 = vpop.f32.mrb[7].mxu0  ;;  %v750_v23 = vpop.f32.mrb[7].mxu1 }
 0x15d   : > { %2519 = vpow2.f32 %v992_v6  ;;  %v862_v24 = vmin.f32 %v3188_v15, 20.0  ;;  %v894_v25 = vmin.f32 %v3191_v16, 20.0  ;;  %v3201_v26 = vadd.f32 %v2351_v18, %v3147_v40 }
 0x15e   : > { %2521 = vpow2.f32 %v924_v9  ;;  %v934_v27 = vmul.f32 1.442695, %v864_v19  ;;  %v998_v28 = vmul.f32 1.442695, %v896_v20  ;;  %v865_v29 = vmin.f32 %v3196_v21, 20.0 }
 0x15f   : > { %2523 = vpow2.f32 %v988_v14  ;;  %v930_v30 = vmul.f32 1.442695, %v862_v24  ;;  %v994_v31 = vmul.f32 1.442695, %v894_v25  ;;  %v897_v32 = vmin.f32 %v3201_v26, 20.0 }
 0x160   : > { %2525 = vpow2.f32 %v934_v27  ;;  %v936_v33 = vmul.f32 1.442695, %v865_v29  ;;  %v3206_v34 = vadd.f32 %v3147_v40, %v622_v22  ;;  %v3209_v35 = vadd.f32 %v3147_v40, %v750_v23 }
 0x161   : > { %2527 = vpow2.f32 %v998_v28  ;;  %v1000_v36 = vmul.f32 1.442695, %v897_v32  ;;  %v2322_v37 = vpop.f32.mrb[8].mxu0  ;;  %v2354_v38 = vpop.f32.mrb[8].mxu1 }
 0x162   : > { %v2510_v39 = vpop.eup %2509  ;;  %2529 = vpow2.f32 %v930_v30  ;;  %v863_v41 = vmin.f32 %v3206_v34, 20.0  ;;  %v895_v42 = vmin.f32 %v3209_v35, 20.0  ;;  %v3214_v45 = vadd.f32 %v2322_v37, %v3147_v40  ;;  %v635_v46 = vpop.f32.mrb[9].mxu0 }
 0x163   : > { %v3216_v49 = vpop.f32.mrb[9].mxu1  ;;  %v2512_v50 = vpop.eup %2511  ;;  %v1052_v51 = vadd.f32 2.0, %v2510_v39  ;;  %2531 = vpow2.f32 %v994_v31  ;;  %v3219_v52 = vadd.f32 %v2354_v38, %v3147_v40  ;;  %v3222_v55 = vadd.f32 %v3147_v40, %v635_v46 }
 0x164   : > { %3965 = vst [vmem:[#allocation11_spill] sm:$0xff] %v3214_v45  ;;  %v3224_v56 = vpop.f32.mrb[10].mxu0  ;;  %v3226_v57 = vpop.f32.mrb[10].mxu1  ;;  %v1084_v61 = vadd.f32 2.0, %v2512_v50  ;;  %2533 = vpow2.f32 %v936_v33  ;;  %v932_v62 = vmul.f32 1.442695, %v863_v41 }
 0x165   : > { %v2514_v58 = vpop.eup %2513  ;;  %v996_v63 = vmul.f32 1.442695, %v895_v42  ;;  %v3228_v0 = vpop.f32.mrb[11].mxu0  ;;  %v3230_v2 = vmul.f32 %v2510_v39, %v1052_v51  ;;  %2535 = vpow2.f32 %v1000_v36  ;;  %v868_v4 = vmin.f32 %v3214_v45, 20.0 }
 0x166   : > { %v2516_v1 = vpop.eup %2515  ;;  %v1050_v3 = vadd.f32 2.0, %v2514_v58  ;;  %v3233_v5 = vpop.f32.mrb[11].mxu1  ;;  %v3235_v7 = vmul.f32 %v2512_v50, %v1084_v61  ;;  %2537 = vpow2.f32 %v932_v62  ;;  %v3971_v45 = vmin.f32 %v3219_v52, 20.0 }
 0x167   : > { %v2518_v6 = vpop.eup %2517  ;;  %v1082_v8 = vadd.f32 2.0, %v2516_v1  ;;  %v1180_v13 = vadd.f32 2.0, %v3230_v2  ;;  %2539 = vpow2.f32 %v996_v63  ;;  %v3244_v23 = vmul.f32 1.442695, %v868_v4 }
 0x168   : > { %v2520_v12 = vpop.eup %2519  ;;  %v3239_v14 = vmul.f32 %v2514_v58, %v1050_v3  ;;  %v1053_v17 = vadd.f32 2.0, %v2518_v6  ;;  %v1212_v19 = vadd.f32 2.0, %v3235_v7 }
 0x169   : > { %v2522_v18 = vpop.eup %2521  ;;  %v3242_v20 = vmul.f32 %v2516_v1, %v1082_v8  ;;  %v1085_v22 = vadd.f32 2.0, %v2520_v12  ;;  %2541 = vrcp.f32 %v1180_v13  ;;  %v3249_v29 = vpop.f32.mrb[12].mxu0 }
 0x16a   : > { %v2524_v24 = vpop.eup %2523  ;;  %v1178_v25 = vadd.f32 2.0, %v3239_v14  ;;  %v3247_v27 = vmul.f32 %v2518_v6, %v1053_v17  ;;  %v1051_v28 = vadd.f32 2.0, %v2522_v18  ;;  %v3251_v30 = vpop.f32.mrb[12].mxu1  ;;  %2543 = vrcp.f32 %v1212_v19 }
 0x16b   : > { %v2526_v31 = vpop.eup %2525  ;;  %v1210_v32 = vadd.f32 2.0, %v3242_v20  ;;  %v3254_v33 = vmul.f32 %v2520_v12, %v1085_v22  ;;  %v1083_v36 = vadd.f32 2.0, %v2524_v24  ;;  %v3256_v37 = vpop.f32.mrb[13].mxu0 }
 0x16c   : > { %v3258_v38 = vpop.f32.mrb[13].mxu1  ;;  %v2528_v39 = vpop.eup %2527  ;;  %2545 = vrcp.f32 %v1178_v25  ;;  %v1181_v41 = vadd.f32 2.0, %v3247_v27  ;;  %v3261_v42 = vmul.f32 %v2522_v18, %v1051_v28  ;;  %v1056_v46 = vadd.f32 2.0, %v2526_v31 }
 0x16d   : > { %v3263_v50 = vpop.f32.mrb[14].mxu0  ;;  %v3265_v51 = vpop.f32.mrb[14].mxu1  ;;  %2547 = vrcp.f32 %v1210_v32  ;;  %v1213_v61 = vadd.f32 2.0, %v3254_v33  ;;  %v3268_v62 = vmul.f32 %v2524_v24, %v1083_v36  ;;  %v1088_v63 = vadd.f32 2.0, %v2528_v39 }
 0x16e   : > { %v2530_v58 = vpop.eup %2529  ;;  %v3270_v1 = vpop.f32.mrb[15].mxu0  ;;  %2549 = vrcp.f32 %v1181_v41  ;;  %v1179_v6 = vadd.f32 2.0, %v3261_v42  ;;  %v3275_v8 = vmul.f32 %v2526_v31, %v1056_v46 }
 0x16f   : > { %v3272_v3 = vpop.f32.mrb[15].mxu1  ;;  %v2532_v4 = vpop.eup %2531  ;;  %v1054_v12 = vadd.f32 2.0, %v2530_v58  ;;  %2551 = vrcp.f32 %v1213_v61  ;;  %v1211_v17 = vadd.f32 2.0, %v3268_v62  ;;  %v3278_v18 = vmul.f32 %v2528_v39, %v1088_v63 }
 0x170   : > { %3966 = vst [vmem:[#allocation12_spill] sm:$0xff] %v3272_v3  ;;  %v2534_v13 = vpop.eup %2533  ;;  %v1086_v19 = vadd.f32 2.0, %v2532_v4  ;;  %2553 = vrcp.f32 %v1179_v6  ;;  %v1184_v24 = vadd.f32 2.0, %v3275_v8 }
 0x171   : > { %v2536_v22 = vpop.eup %2535  ;;  %v3281_v25 = vmul.f32 %v2530_v58, %v1054_v12  ;;  %v1057_v28 = vadd.f32 2.0, %v2534_v13  ;;  %2555 = vrcp.f32 %v1211_v17  ;;  %v1216_v31 = vadd.f32 2.0, %v3278_v18  ;;  %v3289_v6 = vpop.f32.mrb[16].mxu0 }
 0x172   : > { %v2538_v32 = vpop.eup %2537  ;;  %v3284_v36 = vmul.f32 %v2532_v4, %v1086_v19  ;;  %v1089_v41 = vadd.f32 2.0, %v2536_v22  ;;  %2557 = vrcp.f32 %v1184_v24  ;;  %3967 = vst [vmem:[#allocation13_spill] sm:$0xff] %v3289_v6  ;;  %v3291_v9 = vpop.f32.mrb[16].mxu1  ;;  %v1006_v6 = vmul.f32 1.442695, %v3971_v45 }
 0x173   : > { %v2540_v46 = vpop.eup %2539  ;;  %v1182_v39 = vadd.f32 2.0, %v3281_v25  ;;  %v3287_v61 = vmul.f32 %v2534_v13, %v1057_v28  ;;  %v1055_v63 = vadd.f32 2.0, %v2538_v32  ;;  %3968 = vst [vmem:[#allocation14_spill] sm:$0xff] %v3291_v9  ;;  %2559 = vrcp.f32 %v1216_v31  ;;  %v3296_v4 = vpop.f32.mrb[17].mxu0 }
 0x174   : > { %v1214_v58 = vadd.f32 2.0, %v3284_v36  ;;  %v3294_v12 = vmul.f32 %v2536_v22, %v1089_v41  ;;  %v1087_v17 = vadd.f32 2.0, %v2540_v46  ;;  %3969 = vst [vmem:[#allocation15_spill] sm:$0xff] %v3296_v4  ;;  %v3298_v19 = vpop.f32.mrb[17].mxu1  ;;  %v2542_v24 = vpop.eup %2541 }
 0x175   : > { %3970 = vst [vmem:[#allocation16_spill] sm:$0xff] %v3298_v19  ;;  %2561 = vrcp.f32 %v1182_v39  ;;  %v1185_v13 = vadd.f32 2.0, %v3287_v61  ;;  %v3301_v28 = vmul.f32 %v2538_v32, %v1055_v63  ;;  %v3305_v9 = vpop.f32.mrb[18].mxu0  ;;  %v3307_v31 = vpop.f32.mrb[18].mxu1  ;;  %v1308_v41 = vmul.f32 %v2542_v24, %v3230_v2 }
 0x176   : > { %3972 = vst [vmem:[#allocation17_spill] sm:$0xff] %v3305_v9  ;;  %3973 = vst [vmem:[#allocation18_spill] sm:$0xff] %v3307_v31  ;;  %v2544_v22 = vpop.eup %2543  ;;  %2563 = vrcp.f32 %v1214_v58  ;;  %v1217_v4 = vadd.f32 2.0, %v3294_v12  ;;  %v3311_v19 = vmul.f32 %v2540_v46, %v1087_v17  ;;  %v3313_v39 = vpop.f32.mrb[19].mxu0  ;;  %v866_v31 = vmin.f32 %v3222_v55, 20.0 }
 0x177   : > { %3974 = vst [vmem:[#allocation19_spill] sm:$0xff] %v3313_v39  ;;  %v3315_v3 = vpop.f32.mrb[19].mxu1  ;;  %v2546_v32 = vpop.eup %2545  ;;  %v1340_v63 = vmul.f32 %v2544_v22, %v3235_v7  ;;  %2565 = vrcp.f32 %v1185_v13  ;;  %v1183_v45 = vadd.f32 2.0, %v3301_v28  ;;  %v1372_v2 = vmul.f32 %v1308_v41, %v3150_v43 }
 0x178   : > { %3975 = vst [vmem:[#allocation20_spill] sm:$0xff] %v3315_v3  ;;  %v2548_v9 = vpop.eup %2547  ;;  %v1306_v58 = vmul.f32 %v2546_v32, %v3239_v14  ;;  %2567 = vrcp.f32 %v1217_v4  ;;  %v1215_v46 = vadd.f32 2.0, %v3311_v19  ;;  %v938_v7 = vmul.f32 1.442695, %v866_v31 }
 0x179   : > { %v2550_v17 = vpop.eup %2549  ;;  %v1404_v24 = vmul.f32 %v1340_v63, %v3153_v44  ;;  %v1338_v3 = vmul.f32 %v2548_v9, %v3242_v20  ;;  %2569 = vrcp.f32 %v1183_v45  ;;  %v3329_v43 = vadd.f32 %v3147_v40, %v3216_v49  ;;  %v3338_v9 = vpop.f32.mrb[20].mxu0 }
 0x17a   : > { %v2552_v13 = vpop.eup %2551  ;;  %v1370_v22 = vmul.f32 %v1306_v58, %v3156_v47  ;;  %v1309_v39 = vmul.f32 %v2550_v17, %v3247_v27  ;;  %2571 = vrcp.f32 %v1215_v46  ;;  %v3336_v44 = vadd.f32 %v3224_v56, %v3147_v40  ;;  %v3340_v47 = vpop.f32.mrb[20].mxu1 }
 0x17b   : > { %v2554_v14 = vpop.eup %2553  ;;  %v1402_v4 = vmul.f32 %v1338_v3, %v3159_v48  ;;  %v1341_v41 = vmul.f32 %v2552_v13, %v3254_v33  ;;  %2573 = vpow2.f32 %v3244_v23  ;;  %v898_v48 = vmin.f32 %v3329_v43, 20.0  ;;  %v3345_v3 = vpop.f32.mrb[21].mxu0 }
 0x17c   : > { %v2556_v20 = vpop.eup %2555  ;;  %v1373_v27 = vmul.f32 %v1309_v39, %v3164_v53  ;;  %v1307_v49 = vmul.f32 %v2554_v14, %v3261_v42  ;;  %2575 = vpow2.f32 %v1006_v6  ;;  %v3347_v33 = vpop.f32.mrb[21].mxu1  ;;  %v869_v32 = vmin.f32 %v3336_v44, 20.0 }
 0x17d   : > { %v2558_v23 = vpop.eup %2557  ;;  %v1405_v56 = vmul.f32 %v1341_v41, %v3167_v54  ;;  %v1339_v31 = vmul.f32 %v2556_v20, %v3268_v62  ;;  %2577 = vpow2.f32 %v938_v7  ;;  %v3352_v63 = vpop.f32.mrb[22].mxu0  ;;  %v1002_v58 = vmul.f32 1.442695, %v898_v48 }
 0x17e   : > { %v3354_v53 = vpop.f32.mrb[22].mxu1  ;;  %v2560_v42 = vpop.eup %2559  ;;  %v2073_v6 = vpack.c.bf16 %v1373_v27, %v1372_v2  ;;  %v1371_v39 = vmul.f32 %v1307_v49, %v3172_v59  ;;  %v1312_v45 = vmul.f32 %v2558_v23, %v3275_v8  ;;  %v944_v14 = vmul.f32 1.442695, %v869_v32 }
 0x17f   : > { %v3358_v46 = vpop.f32.mrb[23].mxu0  ;;  %v3360_v54 = vpop.f32.mrb[23].mxu1  ;;  %v2153_v17 = vpack.c.bf16 %v1405_v56, %v1404_v24  ;;  %v1403_v7 = vmul.f32 %v1339_v31, %v3175_v60  ;;  %v1344_v13 = vmul.f32 %v2560_v42, %v3278_v18  ;;  %2579 = vpow2.f32 %v1002_v58 }
 0x180   : > { %v2562_v62 = vpop.eup %2561  ;;  %2225 = vst [vmem:[%s3366_s24 + $0x8] sm:$0xff] %v2073_v6   ;;  %v2068_v59 = vpack.c.bf16 %v1371_v39, %v1370_v22  ;;  %v1376_v8 = vmul.f32 %v1312_v45, %v3182_v10  ;;  %2581 = vpow2.f32 %v944_v14  ;;  %v3379_v10 = vadd.f32 %v3226_v57, %v3147_v40 }
 0x181   : > { %v2564_v41 = vpop.eup %2563  ;;  %v1310_v2 = vmul.f32 %v2562_v62, %v3281_v25  ;;  %2241 = vst [vmem:[%s3366_s24 + $0x88] sm:$0xff] %v2153_v17   ;;  %v2148_v60 = vpack.c.bf16 %v1403_v7, %v1402_v4  ;;  %v1408_v18 = vmul.f32 %v1344_v13, %v3185_v11  ;;  %v3383_v25 = vadd.f32 %v3147_v40, %v3228_v0  ;;  %v3396_v57 = vpop.f32.mrb[24].mxu0 }
 0x182   : > { %v2566_v24 = vpop.eup %2565  ;;  %v1342_v20 = vmul.f32 %v2564_v41, %v3284_v36  ;;  %2069 = vst [vmem:[%s3366_s24] sm:$0xff] %v2068_v59   ;;  %v3390_v48 = vadd.f32 %v3147_v40, %v3233_v5  ;;  %v3404_v31 = vpop.f32.mrb[25].mxu0 }
 0x183   : > { %v2568_v27 = vpop.eup %2567  ;;  %v1374_v49 = vmul.f32 %v1310_v2, %v3188_v15  ;;  %v1313_v22 = vmul.f32 %v2566_v24, %v3287_v61  ;;  %2240 = vst [vmem:[%s3366_s24 + $0x80] sm:$0xff] %v2148_v60   ;;  %v3394_v15 = vadd.f32 %v3249_v29, %v3147_v40  ;;  %v3398_v61 = vpop.f32.mrb[24].mxu1 }
 0x184   : > { %v2570_v4 = vpop.eup %2569  ;;  %v1406_v11 = vmul.f32 %v1342_v20, %v3191_v16  ;;  %v1345_v36 = vmul.f32 %v2568_v27, %v3294_v12  ;;  %v901_v16 = vmin.f32 %v3379_v10, 20.0  ;;  %v867_v12 = vmin.f32 %v3383_v25, 20.0  ;;  %v3406_v5 = vpop.f32.mrb[25].mxu1 }
 0x185   : > { %v2572_v0 = vpop.eup %2571  ;;  %v1377_v23 = vmul.f32 %v1313_v22, %v3196_v21  ;;  %v1311_v56 = vmul.f32 %v2570_v4, %v3301_v28  ;;  %v899_v6 = vmin.f32 %v3390_v48, 20.0  ;;  %v872_v21 = vmin.f32 %v3394_v15, 20.0  ;;  %v3412_v39 = vpop.f32.mrb[26].mxu0 }
 0x186   : > { %v2574_v32 = vpop.eup %2573  ;;  %v1409_v29 = vmul.f32 %v1345_v36, %v3201_v26  ;;  %v1343_v42 = vmul.f32 %v2572_v0, %v3311_v19  ;;  %v3414_v28 = vpop.f32.mrb[26].mxu1  ;;  %v1008_v7 = vmul.f32 1.442695, %v901_v16  ;;  %v940_v2 = vmul.f32 1.442695, %v867_v12 }
 0x187   : > { %v2576_v45 = vpop.eup %2575  ;;  %v2083_v58 = vpack.c.bf16 %v1377_v23, %v1376_v8  ;;  %v1375_v62 = vmul.f32 %v1311_v56, %v3206_v34  ;;  %v1060_v17 = vadd.f32 2.0, %v2574_v32  ;;  %v3417_v13 = vpop.f32.mrb[27].mxu0  ;;  %v1004_v27 = vmul.f32 1.442695, %v899_v6 }
 0x188   : > { %v3419_v26 = vpop.f32.mrb[27].mxu1  ;;  %v2578_v19 = vpop.eup %2577  ;;  %v2163_v14 = vpack.c.bf16 %v1409_v29, %v1408_v18  ;;  %v1407_v41 = vmul.f32 %v1343_v42, %v3209_v35  ;;  %v1092_v59 = vadd.f32 2.0, %v2576_v45  ;;  %2583 = vpow2.f32 %v1008_v7 }
 0x189   : > { %2227 = vst [vmem:[%s3366_s24 + $0x18] sm:$0xff] %v2083_v58   ;;  %v2078_v24 = vpack.c.bf16 %v1375_v62, %v1374_v49  ;;  %v3423_v8 = vmul.f32 %v2574_v32, %v1060_v17  ;;  %v1058_v60 = vadd.f32 2.0, %v2578_v19  ;;  %2585 = vpow2.f32 %v940_v2  ;;  %v2580_v22 = vpop.eup %2579  ;;  %v3442_v56 = vpop.f32.mrb[28].mxu0 }
 0x18a   : > { %2243 = vst [vmem:[%s3366_s24 + $0x98] sm:$0xff] %v2163_v14   ;;  %v2158_v34 = vpack.c.bf16 %v1407_v41, %v1406_v11  ;;  %v3426_v20 = vmul.f32 %v2576_v45, %v1092_v59  ;;  %v950_v4 = vmul.f32 1.442695, %v872_v21  ;;  %v3434_v49 = vadd.f32 %v3251_v30, %v3147_v40  ;;  %v2582_v36 = vpop.eup %2581  ;;  %3976 = vst [vmem:[#allocation21_spill] sm:$0xff] %v3442_v56  ;;  %v3444_v16 = vpop.f32.mrb[28].mxu1 }
 0x18b   : > { %2226 = vst [vmem:[%s3366_s24 + $0x10] sm:$0xff] %v2078_v24   ;;  %v1188_v18 = vadd.f32 2.0, %v3423_v8  ;;  %v3430_v35 = vmul.f32 %v2578_v19, %v1058_v60  ;;  %v1090_v11 = vadd.f32 2.0, %v2580_v22  ;;  %2587 = vpow2.f32 %v1004_v27  ;;  %3977 = vst [vmem:[#allocation22_spill] sm:$0xff] %v3444_v16  ;;  %v3448_v29 = vpop.f32.mrb[29].mxu0  ;;  %v3450_v42 = vpop.f32.mrb[29].mxu1 }
 0x18c   : > { %2242 = vst [vmem:[%s3366_s24 + $0x90] sm:$0xff] %v2158_v34   ;;  %v1220_v0 = vadd.f32 2.0, %v3426_v20  ;;  %v3440_v23 = vadd.f32 %v3147_v40, %v3256_v37  ;;  %v1061_v32 = vadd.f32 2.0, %v2582_v36  ;;  %v904_v30 = vmin.f32 %v3434_v49, 20.0  ;;  %3978 = vst [vmem:[#allocation23_spill] sm:$0xff] %v3448_v29  ;;  %v3459_v45 = vpop.f32.mrb[30].mxu0 }
 0x18d   : > { %2589 = vrcp.f32 %v1188_v18  ;;  %v1186_v12 = vadd.f32 2.0, %v3430_v35  ;;  %3979 = vst [vmem:[#allocation24_spill] sm:$0xff] %v3450_v42  ;;  %v3452_v6 = vmul.f32 %v2580_v22, %v1090_v11  ;;  %v3457_v21 = vadd.f32 %v3147_v40, %v3258_v38  ;;  %3980 = vst [vmem:[#allocation25_spill] sm:$0xff] %v3459_v45  ;;  %v3461_v58 = vpop.f32.mrb[30].mxu1  ;;  %v3469_v19 = vpop.f32.mrb[31].mxu0  ;;  %v3984_v27 = vld [vmem:[#allocation12_spill] sm:$0xff] }
 0x18e   : > { %2591 = vrcp.f32 %v1220_v0  ;;  %v870_v37 = vmin.f32 %v3440_v23, 20.0  ;;  %3981 = vst [vmem:[#allocation26_spill] sm:$0xff] %v3461_v58  ;;  %v3463_v62 = vmul.f32 %v2582_v36, %v1061_v32  ;;  %v1014_v17 = vmul.f32 1.442695, %v904_v30  ;;  %3982 = vst [vmem:[#allocation27_spill] sm:$0xff] %v3469_v19  ;;  %v3471_v14 = vpop.f32.mrb[31].mxu1 }
 0x18f   : > { %2593 = vrcp.f32 %v1186_v12  ;;  %v3467_v7 = vadd.f32 %v3263_v50, %v3147_v40  ;;  %3983 = vst [vmem:[#allocation28_spill] sm:$0xff] %v3471_v14  ;;  %v1218_v41 = vadd.f32 2.0, %v3452_v6  ;;  %v902_v59 = vmin.f32 %v3457_v21, 20.0  ;;  %v3985_v0 = vld [vmem:[#allocation13_spill] sm:$0xff] }
 0x190   : > { %2595 = vpow2.f32 %v950_v4  ;;  %v946_v38 = vmul.f32 1.442695, %v870_v37  ;;  %v1189_v2 = vadd.f32 2.0, %v3463_v62  ;;  %v3479_v60 = vadd.f32 %v3265_v51, %v3147_v40 }
 0x191   : > { %2597 = vpow2.f32 %v1014_v17  ;;  %v873_v24 = vmin.f32 %v3467_v7, 20.0  ;;  %v1010_v50 = vmul.f32 1.442695, %v902_v59  ;;  %v3483_v34 = vadd.f32 %v3147_v40, %v3270_v1 }
 0x192   : > { %2599 = vrcp.f32 %v1218_v41  ;;  %v3487_v22 = vadd.f32 %v3147_v40, %v3984_v27  ;;  %v2584_v18 = vpop.eup %2583  ;;  %v905_v36 = vmin.f32 %v3479_v60, 20.0  ;;  %v3492_v11 = vadd.f32 %v3985_v0, %v3147_v40 }
 0x193   : > { %2601 = vrcp.f32 %v1189_v2  ;;  %v952_v4 = vmul.f32 1.442695, %v873_v24  ;;  %v2586_v51 = vpop.eup %2585  ;;  %v1093_v12 = vadd.f32 2.0, %v2584_v18  ;;  %v871_v32 = vmin.f32 %v3483_v34, 20.0 }
 0x194   : > { %2603 = vpow2.f32 %v946_v38  ;;  %v903_v1 = vmin.f32 %v3487_v22, 20.0  ;;  %v1059_v30 = vadd.f32 2.0, %v2586_v51  ;;  %v1016_v37 = vmul.f32 1.442695, %v905_v36  ;;  %v3986_v36 = vld [vmem:[#allocation14_spill] sm:$0xff] }
 0x195   : > { %2605 = vpow2.f32 %v1010_v50  ;;  %v876_v17 = vmin.f32 %v3492_v11, 20.0  ;;  %v2588_v41 = vpop.eup %2587  ;;  %v3497_v59 = vmul.f32 %v2584_v18, %v1093_v12  ;;  %v948_v2 = vmul.f32 1.442695, %v871_v32 }
 0x196   : > { %2607 = vpow2.f32 %v952_v4  ;;  %v1012_v24 = vmul.f32 1.442695, %v903_v1  ;;  %v3499_v0 = vmul.f32 %v2586_v51, %v1059_v30  ;;  %v1091_v14 = vadd.f32 2.0, %v2588_v41  ;;  %v3987_v1 = vld [vmem:[#allocation11_spill] sm:$0xff] }
 0x197   : > { %v2590_v27 = vpop.eup %2589  ;;  %2609 = vpow2.f32 %v1016_v37  ;;  %v958_v38 = vmul.f32 1.442695, %v876_v17  ;;  %v1221_v50 = vadd.f32 2.0, %v3497_v59  ;;  %v3505_v45 = vadd.f32 %v3986_v36, %v3147_v40  ;;  %v3988_v36 = vld [vmem:[#allocation15_spill] sm:$0xff] }
 0x198   : > { %v2592_v19 = vpop.eup %2591  ;;  %v1316_v58 = vmul.f32 %v2590_v27, %v3423_v8  ;;  %2611 = vpow2.f32 %v948_v2  ;;  %v1187_v12 = vadd.f32 2.0, %v3499_v0  ;;  %v3509_v51 = vmul.f32 %v2588_v41, %v1091_v14 }
 0x199   : > { %v2594_v18 = vpop.eup %2593  ;;  %v1348_v4 = vmul.f32 %v2592_v19, %v3426_v20  ;;  %2613 = vpow2.f32 %v1012_v24  ;;  %v908_v37 = vmin.f32 %v3505_v45, 20.0 }
 0x19a   : > { %v2596_v32 = vpop.eup %2595  ;;  %v1380_v30 = vmul.f32 %v1316_v58, %v3987_v1  ;;  %v1314_v8 = vmul.f32 %v2594_v18, %v3430_v35  ;;  %2615 = vrcp.f32 %v1221_v50  ;;  %v1219_v20 = vadd.f32 2.0, %v3509_v51 }
 0x19b   : > { %v2598_v17 = vpop.eup %2597  ;;  %v3515_v2 = vmul.f32 %v1348_v4, %v3219_v52  ;;  %2617 = vrcp.f32 %v1187_v12  ;;  %v1064_v19 = vadd.f32 2.0, %v2596_v32  ;;  %v1022_v58 = vmul.f32 1.442695, %v908_v37 }
 0x19c   : > { %v2600_v27 = vpop.eup %2599  ;;  %v3519_v14 = vmul.f32 %v1314_v8, %v3222_v55  ;;  %v1096_v41 = vadd.f32 2.0, %v2598_v17  ;;  %2619 = vpow2.f32 %v958_v38  ;;  %v3526_v52 = vadd.f32 %v3147_v40, %v3988_v36  ;;  %v3989_v55 = vld [vmem:[#allocation16_spill] sm:$0xff] }
 0x19d   : > { %v2602_v24 = vpop.eup %2601  ;;  %v1346_v35 = vmul.f32 %v2600_v27, %v3452_v6  ;;  %2621 = vrcp.f32 %v1219_v20  ;;  %v3522_v50 = vmul.f32 %v2596_v32, %v1064_v19  ;;  %v3533_v38 = vadd.f32 %v3147_v40, %v3989_v55 }
 0x19e   : > { %v2604_v18 = vpop.eup %2603  ;;  %v1317_v4 = vmul.f32 %v2602_v24, %v3463_v62  ;;  %v3529_v12 = vmul.f32 %v2598_v17, %v1096_v41  ;;  %2623 = vpow2.f32 %v1022_v58  ;;  %v874_v37 = vmin.f32 %v3526_v52, 20.0 }
 0x19f   : > { %v2606_v1 = vpop.eup %2605  ;;  %v3536_v6 = vmul.f32 %v1346_v35, %v3329_v43  ;;  %v1192_v32 = vadd.f32 2.0, %v3522_v50  ;;  %v1062_v8 = vadd.f32 2.0, %v2604_v18  ;;  %v906_v27 = vmin.f32 %v3533_v38, 20.0 }
 0x1a0   : > { %v2608_v20 = vpop.eup %2607  ;;  %v1381_v19 = vmul.f32 %v1317_v4, %v3336_v44  ;;  %v1224_v62 = vadd.f32 2.0, %v3529_v12  ;;  %v1094_v17 = vadd.f32 2.0, %v2606_v1  ;;  %v954_v24 = vmul.f32 1.442695, %v874_v37 }
 0x1a1   : > { %v2610_v41 = vpop.eup %2609  ;;  %2625 = vrcp.f32 %v1192_v32  ;;  %v3543_v58 = vmul.f32 %v2604_v18, %v1062_v8  ;;  %v1065_v43 = vadd.f32 2.0, %v2608_v20  ;;  %v1018_v37 = vmul.f32 1.442695, %v906_v27 }
 0x1a2   : > { %v2612_v35 = vpop.eup %2611  ;;  %v2093_v36 = vpack.c.bf16 %v1381_v19, %v1380_v30  ;;  %2627 = vrcp.f32 %v1224_v62  ;;  %v3545_v55 = vmul.f32 %v2606_v1, %v1094_v17  ;;  %v1097_v42 = vadd.f32 2.0, %v2610_v41 }
 0x1a3   : > { %v2614_v29 = vpop.eup %2613  ;;  %v1190_v44 = vadd.f32 2.0, %v3543_v58  ;;  %v3548_v4 = vmul.f32 %v2608_v20, %v1065_v43  ;;  %v1063_v16 = vadd.f32 2.0, %v2612_v35  ;;  %2629 = vpow2.f32 %v954_v24 }
 0x1a4   : > { %v2616_v56 = vpop.eup %2615  ;;  %2229 = vst [vmem:[%s3366_s24 + $0x28] sm:$0xff] %v2093_v36   ;;  %v1222_v18 = vadd.f32 2.0, %v3545_v55  ;;  %v3552_v32 = vmul.f32 %v2610_v41, %v1097_v42  ;;  %v1095_v8 = vadd.f32 2.0, %v2614_v29 }
 0x1a5   : > { %v2618_v30 = vpop.eup %2617  ;;  %v1349_v1 = vmul.f32 %v2616_v56, %v3497_v59  ;;  %2631 = vrcp.f32 %v1190_v44  ;;  %v1193_v19 = vadd.f32 2.0, %v3548_v4  ;;  %v3556_v62 = vmul.f32 %v2612_v35, %v1063_v16 }
 0x1a6   : > { %v2620_v20 = vpop.eup %2619  ;;  %v1315_v17 = vmul.f32 %v2618_v30, %v3499_v0  ;;  %2633 = vrcp.f32 %v1222_v18  ;;  %v1225_v43 = vadd.f32 2.0, %v3552_v32  ;;  %v3560_v24 = vmul.f32 %v2614_v29, %v1095_v8  ;;  %v3990_v8 = vld [vmem:[#allocation17_spill] sm:$0xff] }
 0x1a7   : > { %v2622_v42 = vpop.eup %2621  ;;  %v1413_v41 = vmul.f32 %v1349_v1, %v3379_v10  ;;  %2635 = vrcp.f32 %v1193_v19  ;;  %v1191_v27 = vadd.f32 2.0, %v3556_v62  ;;  %v1068_v56 = vadd.f32 2.0, %v2620_v20 }
 0x1a8   : > { %v2624_v59 = vpop.eup %2623  ;;  %v1379_v16 = vmul.f32 %v1315_v17, %v3383_v25  ;;  %v1347_v35 = vmul.f32 %v2622_v42, %v3509_v51  ;;  %2637 = vrcp.f32 %v1225_v43  ;;  %v1223_v0 = vadd.f32 2.0, %v3560_v24  ;;  %v3992_v43 = vld [vmem:[#allocation19_spill] sm:$0xff] }
 0x1a9   : > { %v2173_v29 = vpack.c.bf16 %v1413_v41, %v3515_v2  ;;  %2639 = vrcp.f32 %v1191_v27  ;;  %v3568_v36 = vmul.f32 %v2620_v20, %v1068_v56  ;;  %v1100_v10 = vadd.f32 2.0, %v2624_v59  ;;  %v3991_v2 = vld [vmem:[#allocation18_spill] sm:$0xff] }
 0x1aa   : > { %v2088_v44 = vpack.c.bf16 %v1379_v16, %v3519_v14  ;;  %v1411_v18 = vmul.f32 %v1347_v35, %v3390_v48  ;;  %2641 = vrcp.f32 %v1223_v0  ;;  %v3574_v25 = vadd.f32 %v3990_v8, %v3147_v40 }
 0x1ab   : > { %v2626_v51 = vpop.eup %2625  ;;  %2245 = vst [vmem:[%s3366_s24 + $0xa8] sm:$0xff] %v2173_v29   ;;  %v1196_v30 = vadd.f32 2.0, %v3568_v36  ;;  %v3578_v1 = vmul.f32 %v2624_v59, %v1100_v10  ;;  %2643 = vpow2.f32 %v1018_v37  ;;  %v3582_v19 = vadd.f32 %v3991_v2, %v3147_v40  ;;  %v3993_v10 = vld [vmem:[#allocation20_spill] sm:$0xff] }
 0x1ac   : > { %v2628_v14 = vpop.eup %2627  ;;  %2228 = vst [vmem:[%s3366_s24 + $0x20] sm:$0xff] %v2088_v44   ;;  %v2168_v48 = vpack.c.bf16 %v1411_v18, %v3536_v6  ;;  %v1320_v20 = vmul.f32 %v2626_v51, %v3522_v50  ;;  %v877_v17 = vmin.f32 %v3574_v25, 20.0  ;;  %v3590_v42 = vadd.f32 %v3147_v40, %v3992_v43 }
 0x1ad   : > { %v2630_v41 = vpop.eup %2629  ;;  %v1352_v27 = vmul.f32 %v2628_v14, %v3529_v12  ;;  %2645 = vrcp.f32 %v1196_v30  ;;  %v1228_v37 = vadd.f32 2.0, %v3578_v1  ;;  %v909_v56 = vmin.f32 %v3582_v19, 20.0 }
 0x1ae   : > { %2244 = vst [vmem:[%s3366_s24 + $0xa0] sm:$0xff] %v2168_v48   ;;  %v1384_v59 = vmul.f32 %v1320_v20, %v3394_v15  ;;  %v1066_v6 = vadd.f32 2.0, %v2630_v41  ;;  %v960_v16 = vmul.f32 1.442695, %v877_v17  ;;  %v875_v50 = vmin.f32 %v3590_v42, 20.0 }
 0x1af   : > { %v2632_v35 = vpop.eup %2631  ;;  %v1416_v0 = vmul.f32 %v1352_v27, %v3434_v49  ;;  %2647 = vrcp.f32 %v1228_v37  ;;  %v1024_v29 = vmul.f32 1.442695, %v909_v56  ;;  %v3601_v12 = vadd.f32 %v3147_v40, %v3993_v10 }
 0x1b0   : > { %v2634_v44 = vpop.eup %2633  ;;  %v1318_v18 = vmul.f32 %v2632_v35, %v3543_v58  ;;  %v3604_v8 = vmul.f32 %v2630_v41, %v1066_v6  ;;  %2649 = vpow2.f32 %v960_v16  ;;  %v956_v15 = vmul.f32 1.442695, %v875_v50 }
 0x1b1   : > { %v2636_v51 = vpop.eup %2635  ;;  %v1350_v30 = vmul.f32 %v2634_v44, %v3545_v55  ;;  %2651 = vpow2.f32 %v1024_v29  ;;  %v907_v2 = vmin.f32 %v3601_v12, 20.0  ;;  %v3610_v49 = vadd.f32 %v3338_v9, %v3147_v40 }
 0x1b2   : > { %v2638_v14 = vpop.eup %2637  ;;  %v1382_v48 = vmul.f32 %v1318_v18, %v3440_v23  ;;  %v1321_v20 = vmul.f32 %v2636_v51, %v3548_v4  ;;  %v1194_v58 = vadd.f32 2.0, %v3604_v8  ;;  %2653 = vpow2.f32 %v956_v15  ;;  %v3623_v23 = vld [vmem:[%s3945_s2] ss:$0 sm:$0xff] }
 0x1b3   : > { %v2640_v17 = vpop.eup %2639  ;;  %v1414_v43 = vmul.f32 %v1350_v30, %v3457_v21  ;;  %v1353_v55 = vmul.f32 %v2638_v14, %v3552_v32  ;;  %v1020_v41 = vmul.f32 1.442695, %v907_v2  ;;  %v880_v27 = vmin.f32 %v3610_v49, 20.0 }
 0x1b4   : > { %v2642_v37 = vpop.eup %2641  ;;  %v1385_v40 = vmul.f32 %v1321_v20, %v3467_v7  ;;  %v1319_v9 = vmul.f32 %v2640_v17, %v3556_v62  ;;  %2655 = vrcp.f32 %v1194_v58  ;;  %v3627_v21 = vadd.f32 %v3623_v23, %v3340_v47 }
 0x1b5   : > { %v2644_v4 = vpop.eup %2643  ;;  %v1417_v32 = vmul.f32 %v1353_v55, %v3479_v60  ;;  %v1351_v56 = vmul.f32 %v2642_v37, %v3560_v24  ;;  %2657 = vpow2.f32 %v1020_v41  ;;  %v966_v7 = vmul.f32 1.442695, %v880_v27 }
 0x1b6   : > { %v2103_v62 = vpack.c.bf16 %v1385_v40, %v1384_v59  ;;  %v1383_v6 = vmul.f32 %v1319_v9, %v3483_v34  ;;  %v1098_v16 = vadd.f32 2.0, %v2644_v4  ;;  %v912_v50 = vmin.f32 %v3627_v21, 20.0 }
 0x1b7   : > { %v2646_v35 = vpop.eup %2645  ;;  %v2183_v29 = vpack.c.bf16 %v1417_v32, %v1416_v0  ;;  %v1415_v47 = vmul.f32 %v1351_v56, %v3487_v22  ;;  %2659 = vpow2.f32 %v966_v7  ;;  %v3636_v60 = vadd.f32 %v3623_v23, %v3345_v3 }
 0x1b8   : > { %2231 = vst [vmem:[%s3366_s24 + $0x38] sm:$0xff] %v2103_v62   ;;  %v2098_v24 = vpack.c.bf16 %v1383_v6, %v1382_v48  ;;  %v1324_v59 = vmul.f32 %v2646_v35, %v3568_v36  ;;  %v3640_v10 = vmul.f32 %v2644_v4, %v1098_v16  ;;  %v1030_v34 = vmul.f32 1.442695, %v912_v50 }
 0x1b9   : > { %v2648_v44 = vpop.eup %2647  ;;  %2247 = vst [vmem:[%s3366_s24 + $0xb8] sm:$0xff] %v2183_v29   ;;  %v2178_v18 = vpack.c.bf16 %v1415_v47, %v1414_v43  ;;  %v878_v0 = vmin.f32 %v3636_v60, 20.0  ;;  %v3646_v22 = vadd.f32 %v3623_v23, %v3347_v33  ;;  %v3650_v3 = vadd.f32 %v3623_v23, %v3352_v63 }
 0x1ba   : > { %v2650_v15 = vpop.eup %2649  ;;  %2230 = vst [vmem:[%s3366_s24 + $0x30] sm:$0xff] %v2098_v24   ;;  %v1356_v36 = vmul.f32 %v2648_v44, %v3578_v1  ;;  %v1226_v51 = vadd.f32 2.0, %v3640_v10  ;;  %2661 = vpow2.f32 %v1030_v34  ;;  %v3659_v58 = vmul.f32 %v1324_v59, %v3492_v11 }
 0x1bb   : > { %v2652_v30 = vpop.eup %2651  ;;  %2246 = vst [vmem:[%s3366_s24 + $0xb0] sm:$0xff] %v2178_v18   ;;  %v1069_v2 = vadd.f32 2.0, %v2650_v15  ;;  %v962_v14 = vmul.f32 1.442695, %v878_v0  ;;  %v910_v48 = vmin.f32 %v3646_v22, 20.0  ;;  %v881_v33 = vmin.f32 %v3650_v3, 20.0 }
 0x1bc   : > { %v2654_v20 = vpop.eup %2653  ;;  %2663 = vrcp.f32 %v1226_v51  ;;  %v1101_v63 = vadd.f32 2.0, %v2652_v30  ;;  %v3663_v1 = vadd.f32 %v3623_v23, %v3354_v53  ;;  %v3672_v11 = vadd.f32 %v3623_v23, %v3358_v46 }
 0x1bd   : > { %v3665_v17 = vmul.f32 %v2650_v15, %v1069_v2  ;;  %v1067_v43 = vadd.f32 2.0, %v2654_v20  ;;  %2665 = vpow2.f32 %v962_v14  ;;  %v1026_v55 = vmul.f32 1.442695, %v910_v48 }
 0x1be   : > { %v2656_v41 = vpop.eup %2655  ;;  %v3667_v27 = vmul.f32 %v2652_v30, %v1101_v63  ;;  %v968_v37 = vmul.f32 1.442695, %v881_v33  ;;  %v913_v40 = vmin.f32 %v3663_v1, 20.0  ;;  %v3675_v4 = vmul.f32 %v1356_v36, %v3505_v45 }
 0x1bf   : > { %v2658_v9 = vpop.eup %2657  ;;  %v1197_v53 = vadd.f32 2.0, %v3665_v17  ;;  %v3678_v32 = vmul.f32 %v2654_v20, %v1067_v43  ;;  %2667 = vpow2.f32 %v1026_v55  ;;  %v1322_v16 = vmul.f32 %v2656_v41, %v3604_v8 }
 0x1c0   : > { %v1229_v56 = vadd.f32 2.0, %v3667_v27  ;;  %v1099_v7 = vadd.f32 2.0, %v2658_v9  ;;  %2669 = vpow2.f32 %v968_v37  ;;  %v1032_v62 = vmul.f32 1.442695, %v913_v40 }
 0x1c1   : > { %v2660_v6 = vpop.eup %2659  ;;  %2671 = vrcp.f32 %v1197_v53  ;;  %v1195_v46 = vadd.f32 2.0, %v3678_v32  ;;  %v879_v50 = vmin.f32 %v3672_v11, 20.0  ;;  %v3688_v29 = vadd.f32 %v3623_v23, %v3360_v54 }
 0x1c2   : > { %2673 = vrcp.f32 %v1229_v56  ;;  %v3684_v45 = vmul.f32 %v2658_v9, %v1099_v7  ;;  %v1072_v35 = vadd.f32 2.0, %v2660_v6  ;;  %v3692_v24 = vadd.f32 %v3623_v23, %v3396_v57 }
 0x1c3   : > { %2675 = vrcp.f32 %v1195_v46  ;;  %v964_v47 = vmul.f32 1.442695, %v879_v50  ;;  %v3696_v8 = vadd.f32 %v3623_v23, %v3398_v61  ;;  %v911_v18 = vmin.f32 %v3688_v29, 20.0 }
 0x1c4   : > { %v2662_v59 = vpop.eup %2661  ;;  %v1227_v34 = vadd.f32 2.0, %v3684_v45  ;;  %v3699_v44 = vmul.f32 %v2660_v6, %v1072_v35  ;;  %2677 = vpow2.f32 %v1032_v62  ;;  %v884_v0 = vmin.f32 %v3692_v24, 20.0 }
 0x1c5   : > { %v1104_v54 = vadd.f32 2.0, %v2662_v59  ;;  %2679 = vpow2.f32 %v964_v47  ;;  %v916_v15 = vmin.f32 %v3696_v8, 20.0  ;;  %v1028_v61 = vmul.f32 1.442695, %v911_v18 }
 0x1c6   : > { %v2664_v57 = vpop.eup %2663  ;;  %2681 = vrcp.f32 %v1227_v34  ;;  %v1200_v36 = vadd.f32 2.0, %v3699_v44  ;;  %v3707_v51 = vadd.f32 %v3623_v23, %v3404_v31  ;;  %v3710_v2 = vmul.f32 %v1322_v16, %v3526_v52 }
 0x1c7   : > { %v2666_v30 = vpop.eup %2665  ;;  %v3712_v14 = vmul.f32 %v2662_v59, %v1104_v54  ;;  %v974_v48 = vmul.f32 1.442695, %v884_v0  ;;  %v1038_v33 = vmul.f32 1.442695, %v916_v15  ;;  %v3717_v43 = vadd.f32 %v3623_v23, %v3406_v5 }
 0x1c8   : > { %2683 = vrcp.f32 %v1200_v36  ;;  %v1070_v20 = vadd.f32 2.0, %v2666_v30  ;;  %v882_v63 = vmin.f32 %v3707_v51, 20.0  ;;  %v1354_v31 = vmul.f32 %v2664_v57, %v3640_v10 }
 0x1c9   : > { %v2668_v55 = vpop.eup %2667  ;;  %v1232_v41 = vadd.f32 2.0, %v3712_v14  ;;  %2685 = vpow2.f32 %v1028_v61  ;;  %v3723_v52 = vadd.f32 %v3623_v23, %v3412_v39  ;;  %v914_v7 = vmin.f32 %v3717_v43, 20.0 }
 0x1ca   : > { %v2670_v37 = vpop.eup %2669  ;;  %v3725_v40 = vmul.f32 %v2666_v30, %v1070_v20  ;;  %v1102_v9 = vadd.f32 2.0, %v2668_v55  ;;  %2687 = vpow2.f32 %v974_v48  ;;  %v970_v53 = vmul.f32 1.442695, %v882_v63 }
 0x1cb   : > { %v2672_v56 = vpop.eup %2671  ;;  %2689 = vrcp.f32 %v1232_v41  ;;  %v1073_v5 = vadd.f32 2.0, %v2670_v37  ;;  %v885_v10 = vmin.f32 %v3723_v52, 20.0  ;;  %v1034_v47 = vmul.f32 1.442695, %v914_v7 }
 0x1cc   : > { %v2674_v62 = vpop.eup %2673  ;;  %v1325_v6 = vmul.f32 %v2672_v56, %v3665_v17  ;;  %v1198_v16 = vadd.f32 2.0, %v3725_v40  ;;  %v3731_v39 = vmul.f32 %v2668_v55, %v1102_v9  ;;  %2691 = vpow2.f32 %v1038_v33 }
 0x1cd   : > { %v2676_v46 = vpop.eup %2675  ;;  %v1357_v50 = vmul.f32 %v2674_v62, %v3667_v27  ;;  %v3734_v35 = vmul.f32 %v2670_v37, %v1073_v5  ;;  %2693 = vpow2.f32 %v970_v53  ;;  %v3761_v41 = vadd.f32 %v3623_v23, %v3417_v13 }
 0x1ce   : > { %v2678_v59 = vpop.eup %2677  ;;  %v1389_v34 = vmul.f32 %v1325_v6, %v3574_v25  ;;  %v1323_v18 = vmul.f32 %v2676_v46, %v3678_v32  ;;  %2695 = vrcp.f32 %v1198_v16  ;;  %v1230_v17 = vadd.f32 2.0, %v3731_v39 }
 0x1cf   : > { %v2680_v54 = vpop.eup %2679  ;;  %v1421_v0 = vmul.f32 %v1357_v50, %v3582_v19  ;;  %v1201_v15 = vadd.f32 2.0, %v3734_v35  ;;  %v1105_v57 = vadd.f32 2.0, %v2678_v59  ;;  %2697 = vpow2.f32 %v1034_v47 }
 0x1d0   : > { %v2682_v27 = vpop.eup %2681  ;;  %v2113_v36 = vpack.c.bf16 %v1389_v34, %v3659_v58  ;;  %v1387_v61 = vmul.f32 %v1323_v18, %v3590_v42  ;;  %2699 = vrcp.f32 %v1230_v17  ;;  %v1071_v25 = vadd.f32 2.0, %v2680_v54 }
 0x1d1   : > { %v2193_v32 = vpack.c.bf16 %v1421_v0, %v3675_v4  ;;  %v1355_v30 = vmul.f32 %v2682_v27, %v3684_v45  ;;  %2701 = vrcp.f32 %v1201_v15  ;;  %v3745_v48 = vmul.f32 %v2678_v59, %v1105_v57 }
 0x1d2   : > { %v2684_v19 = vpop.eup %2683  ;;  %2233 = vst [vmem:[%s3366_s24 + $0x48] sm:$0xff] %v2113_v36   ;;  %v2108_v33 = vpack.c.bf16 %v1387_v61, %v3710_v2  ;;  %v3749_v20 = vmul.f32 %v2680_v54, %v1071_v25  ;;  %v976_v58 = vmul.f32 1.442695, %v885_v10  ;;  %v3753_v42 = vadd.f32 %v3623_v23, %v3414_v28 }
 0x1d3   : > { %v2686_v63 = vpop.eup %2685  ;;  %v1418_v4 = vmul.f32 %v1354_v31, %v3533_v38  ;;  %2249 = vst [vmem:[%s3366_s24 + $0xc8] sm:$0xff] %v2193_v32   ;;  %v1419_v45 = vmul.f32 %v1355_v30, %v3601_v12  ;;  %v1233_v55 = vadd.f32 2.0, %v3745_v48  ;;  %v1328_v31 = vmul.f32 %v2684_v19, %v3699_v44 }
 0x1d4   : > { %v2688_v2 = vpop.eup %2687  ;;  %2232 = vst [vmem:[%s3366_s24 + $0x40] sm:$0xff] %v2108_v33   ;;  %v1199_v37 = vadd.f32 2.0, %v3749_v20  ;;  %v1103_v9 = vadd.f32 2.0, %v2686_v63  ;;  %2703 = vpow2.f32 %v976_v58  ;;  %v917_v28 = vmin.f32 %v3753_v42, 20.0  ;;  %v3994_v58 = vld [vmem:[#allocation21_spill] sm:$0xff] }
 0x1d5   : > { %v2690_v53 = vpop.eup %2689  ;;  %v2188_v38 = vpack.c.bf16 %v1419_v45, %v1418_v4  ;;  %2705 = vrcp.f32 %v1233_v55  ;;  %v1076_v12 = vadd.f32 2.0, %v2688_v2  ;;  %v883_v16 = vmin.f32 %v3761_v41, 20.0 }
 0x1d6   : > { %v2692_v56 = vpop.eup %2691  ;;  %v1360_v5 = vmul.f32 %v2690_v53, %v3712_v14  ;;  %2707 = vrcp.f32 %v1199_v37  ;;  %v3768_v13 = vmul.f32 %v2686_v63, %v1103_v9  ;;  %v1040_v7 = vmul.f32 1.442695, %v917_v28 }
 0x1d7   : > { %v2694_v10 = vpop.eup %2693  ;;  %2248 = vst [vmem:[%s3366_s24 + $0xc0] sm:$0xff] %v2188_v38   ;;  %v3771_v62 = vmul.f32 %v2688_v2, %v1076_v12  ;;  %v1108_v6 = vadd.f32 2.0, %v2692_v56  ;;  %v3776_v46 = vadd.f32 %v3623_v23, %v3419_v26  ;;  %v972_v17 = vmul.f32 1.442695, %v883_v16  ;;  %v3996_v2 = vld [vmem:[#allocation23_spill] sm:$0xff] }
 0x1d8   : > { %v2696_v44 = vpop.eup %2695  ;;  %v1231_v50 = vadd.f32 2.0, %v3768_v13  ;;  %v1074_v47 = vadd.f32 2.0, %v2694_v10  ;;  %2709 = vpow2.f32 %v1040_v7  ;;  %v1392_v27 = vmul.f32 %v1328_v31, %v3610_v49 }
 0x1d9   : > { %v2698_v14 = vpop.eup %2697  ;;  %v1326_v59 = vmul.f32 %v2696_v44, %v3725_v40  ;;  %v1204_v34 = vadd.f32 2.0, %v3771_v62  ;;  %v3781_v18 = vmul.f32 %v2692_v56, %v1108_v6  ;;  %v915_v26 = vmin.f32 %v3776_v46, 20.0 }
 0x1da   : > { %v2700_v54 = vpop.eup %2699  ;;  %2711 = vrcp.f32 %v1231_v50  ;;  %v3783_v0 = vmul.f32 %v2694_v10, %v1074_v47  ;;  %v1106_v15 = vadd.f32 2.0, %v2698_v14  ;;  %v1424_v36 = vmul.f32 %v1360_v5, %v3627_v21  ;;  %v3997_v10 = vld [vmem:[#allocation24_spill] sm:$0xff] }
 0x1db   : > { %v2702_v57 = vpop.eup %2701  ;;  %v1358_v61 = vmul.f32 %v2700_v54, %v3731_v39  ;;  %v1236_v40 = vadd.f32 2.0, %v3781_v18  ;;  %v1390_v25 = vmul.f32 %v1326_v59, %v3636_v60  ;;  %2713 = vpow2.f32 %v972_v17  ;;  %v3995_v60 = vld [vmem:[#allocation22_spill] sm:$0xff] }
 0x1dc   : > { %v1329_v32 = vmul.f32 %v2702_v57, %v3734_v35  ;;  %v1202_v30 = vadd.f32 2.0, %v3783_v0  ;;  %2715 = vrcp.f32 %v1204_v34  ;;  %v3793_v19 = vmul.f32 %v2698_v14, %v1106_v15 }
 0x1dd   : > { %v1036_v33 = vmul.f32 1.442695, %v915_v26  ;;  %v3797_v49 = vadd.f32 %v3623_v23, %v3994_v58  ;;  %v1422_v39 = vmul.f32 %v1358_v61, %v3646_v22  ;;  %2717 = vrcp.f32 %v1236_v40 }
 0x1de   : > { %v2704_v21 = vpop.eup %2703  ;;  %v1393_v63 = vmul.f32 %v1329_v32, %v3650_v3  ;;  %v3803_v35 = vadd.f32 %v3623_v23, %v3995_v60  ;;  %v3808_v37 = vadd.f32 %v3623_v23, %v3996_v2  ;;  %v3820_v6 = vadd.f32 %v3623_v23, %v3997_v10 }
 0x1df   : > { %v2706_v4 = vpop.eup %2705  ;;  %v1077_v45 = vadd.f32 2.0, %v2704_v21  ;;  %2719 = vpow2.f32 %v1036_v33  ;;  %v888_v55 = vmin.f32 %v3797_v49, 20.0 }
 0x1e0   : > { %v2708_v9 = vpop.eup %2707  ;;  %v2123_v28 = vpack.c.bf16 %v1393_v63, %v1392_v27  ;;  %v1361_v22 = vmul.f32 %v2706_v4, %v3745_v48  ;;  %2721 = vrcp.f32 %v1202_v30  ;;  %v920_v3 = vmin.f32 %v3803_v35, 20.0  ;;  %v3998_v48 = vld [vmem:[#allocation25_spill] sm:$0xff] }
 0x1e1   : > { %v1327_v53 = vmul.f32 %v2708_v9, %v3749_v20  ;;  %v3813_v38 = vmul.f32 %v2704_v21, %v1077_v45  ;;  %v982_v31 = vmul.f32 1.442695, %v888_v55  ;;  %v886_v12 = vmin.f32 %v3808_v37, 20.0  ;;  %v4000_v45 = vld [vmem:[#allocation27_spill] sm:$0xff] }
 0x1e2   : > { %v2710_v56 = vpop.eup %2709  ;;  %2235 = vst [vmem:[%s3366_s24 + $0x58] sm:$0xff] %v2123_v28   ;;  %v1425_v5 = vmul.f32 %v1361_v22, %v3663_v1  ;;  %v1046_v7 = vmul.f32 1.442695, %v920_v3  ;;  %v3824_v16 = vadd.f32 %v3623_v23, %v3998_v48  ;;  %v918_v59 = vmin.f32 %v3820_v6, 20.0  ;;  %v4001_v28 = vld [vmem:[#allocation28_spill] sm:$0xff] }
 0x1e3   : > { %v1391_v20 = vmul.f32 %v1327_v53, %v3672_v11  ;;  %v1205_v44 = vadd.f32 2.0, %v3813_v38  ;;  %v1109_v50 = vadd.f32 2.0, %v2710_v56  ;;  %2723 = vpow2.f32 %v982_v31 }
 0x1e4   : > { %v2712_v47 = vpop.eup %2711  ;;  %v2203_v14 = vpack.c.bf16 %v1425_v5, %v1424_v36  ;;  %2725 = vpow2.f32 %v1046_v7  ;;  %v978_v1 = vmul.f32 1.442695, %v886_v12  ;;  %v1234_v11 = vadd.f32 2.0, %v3793_v19 }
 0x1e5   : > { %v2118_v34 = vpack.c.bf16 %v1391_v20, %v1390_v25  ;;  %v1359_v17 = vmul.f32 %v2712_v47, %v3768_v13  ;;  %2727 = vrcp.f32 %v1205_v44  ;;  %v1173_v54 = vmul.f32 %v2710_v56, %v1109_v50  ;;  %v2714_v15 = vpop.eup %2713  ;;  %v3999_v25 = vld [vmem:[#allocation26_spill] sm:$0xff] }
 0x1e6   : > { %2251 = vst [vmem:[%s3366_s24 + $0xd8] sm:$0xff] %v2203_v14   ;;  %2729 = vpow2.f32 %v978_v1  ;;  %v1042_v26 = vmul.f32 1.442695, %v918_v59  ;;  %v889_v57 = vmin.f32 %v3824_v16, 20.0  ;;  %v2716_v27 = vpop.eup %2715  ;;  %v1075_v40 = vadd.f32 2.0, %v2714_v15 }
 0x1e7   : > { %2234 = vst [vmem:[%s3366_s24 + $0x50] sm:$0xff] %v2118_v34   ;;  %v1423_v36 = vmul.f32 %v1359_v17, %v3688_v29  ;;  %v1237_v61 = vadd.f32 2.0, %v1173_v54  ;;  %v3837_v13 = vadd.f32 %v3623_v23, %v3999_v25  ;;  %v2718_v32 = vpop.eup %2717  ;;  %v3843_v55 = vadd.f32 %v3623_v23, %v4000_v45 }
 0x1e8   : > { %2731 = vpow2.f32 %v1042_v26  ;;  %v984_v30 = vmul.f32 1.442695, %v889_v57  ;;  %v1139_v21 = vmul.f32 %v2714_v15, %v1075_v40  ;;  %v3847_v22 = vadd.f32 %v3623_v23, %v4001_v28 }
 0x1e9   : > { %v2720_v33 = vpop.eup %2719  ;;  %v2198_v58 = vpack.c.bf16 %v1423_v36, %v1422_v39  ;;  %2733 = vrcp.f32 %v1237_v61  ;;  %v921_v4 = vmin.f32 %v3837_v13, 20.0  ;;  %v1332_v3 = vmul.f32 %v2716_v27, %v3771_v62 }
 0x1ea   : > { %v2722_v63 = vpop.eup %2721  ;;  %v1107_v60 = vadd.f32 2.0, %v2720_v33  ;;  %2735 = vpow2.f32 %v984_v30  ;;  %v1203_v29 = vadd.f32 2.0, %v1139_v21  ;;  %v887_v53 = vmin.f32 %v3843_v55, 20.0 }
 0x1eb   : > { %2250 = vst [vmem:[%s3366_s24 + $0xd0] sm:$0xff] %v2198_v58   ;;  %2737 = vrcp.f32 %v1234_v11  ;;  %v1048_v9 = vmul.f32 1.442695, %v921_v4  ;;  %v919_v5 = vmin.f32 %v3847_v22, 20.0  ;;  %v1396_v62 = vmul.f32 %v1332_v3, %v3692_v24 }
 0x1ec   : > { %v1171_v2 = vmul.f32 %v2720_v33, %v1107_v60  ;;  %2739 = vrcp.f32 %v1203_v29  ;;  %v980_v48 = vmul.f32 1.442695, %v887_v53  ;;  %v1364_v1 = vmul.f32 %v2718_v32, %v3781_v18 }
 0x1ed   : > { %v2724_v39 = vpop.eup %2723  ;;  %2741 = vpow2.f32 %v1048_v9  ;;  %v1044_v50 = vmul.f32 1.442695, %v919_v5  ;;  %v1330_v24 = vmul.f32 %v2722_v63, %v3783_v0 }
 0x1ee   : > { %v2726_v31 = vpop.eup %2725  ;;  %v1235_v12 = vadd.f32 2.0, %v1171_v2  ;;  %v1080_v56 = vadd.f32 2.0, %v2724_v39  ;;  %v1428_v40 = vmul.f32 %v1364_v1, %v3696_v8 }
 0x1ef   : > { %v2728_v7 = vpop.eup %2727  ;;  %v1112_v10 = vadd.f32 2.0, %v2726_v31  ;;  %v1394_v8 = vmul.f32 %v1330_v24, %v3707_v51 }
 0x1f0   : > { %v2730_v20 = vpop.eup %2729  ;;  %v1333_v44 = vmul.f32 %v2728_v7, %v3813_v38  ;;  %2743 = vrcp.f32 %v1235_v12  ;;  %v3853_v23 = vmul.f32 %v2724_v39, %v1080_v56 }
 0x1f1   : > { %v1078_v47 = vadd.f32 2.0, %v2730_v20  ;;  %2745 = vpow2.f32 %v980_v48  ;;  %v3858_v34 = vmul.f32 %v2726_v31, %v1112_v10 }
 0x1f2   : > { %v2732_v14 = vpop.eup %2731  ;;  %v1397_v59 = vmul.f32 %v1333_v44, %v3723_v52  ;;  %2747 = vpow2.f32 %v1044_v50  ;;  %v1208_v38 = vadd.f32 2.0, %v3853_v23 }
 0x1f3   : > { %v2734_v17 = vpop.eup %2733  ;;  %v1110_v15 = vadd.f32 2.0, %v2732_v14  ;;  %v1142_v36 = vmul.f32 %v2730_v20, %v1078_v47  ;;  %v1240_v18 = vadd.f32 2.0, %v3858_v34 }
 0x1f4   : > { %v2736_v11 = vpop.eup %2735  ;;  %v2133_v26 = vpack.c.bf16 %v1397_v59, %v1396_v62  ;;  %v1365_v57 = vmul.f32 %v2734_v17, %v1173_v54  ;;  %2749 = vrcp.f32 %v1208_v38 }
 0x1f5   : > { %v2738_v27 = vpop.eup %2737  ;;  %v1081_v61 = vadd.f32 2.0, %v2736_v11  ;;  %v1174_v25 = vmul.f32 %v2732_v14, %v1110_v15  ;;  %v1206_v0 = vadd.f32 2.0, %v1142_v36  ;;  %2751 = vrcp.f32 %v1240_v18 }
 0x1f6   : > { %2237 = vst [vmem:[%s3366_s24 + $0x68] sm:$0xff] %v2133_v26   ;;  %v1429_v52 = vmul.f32 %v1365_v57, %v3753_v42  ;;  %v2740_v32 = vpop.eup %2739  ;;  %v1362_v54 = vmul.f32 %v2738_v27, %v3793_v19 }
 0x1f7   : > { %v1145_v30 = vmul.f32 %v2736_v11, %v1081_v61  ;;  %v2742_v33 = vpop.eup %2741  ;;  %v1331_v60 = vmul.f32 %v2740_v32, %v1139_v21  ;;  %v1238_v45 = vadd.f32 2.0, %v1174_v25 }
 0x1f8   : > { %v2213_v58 = vpack.c.bf16 %v1429_v52, %v1428_v40  ;;  %v1113_v4 = vadd.f32 2.0, %v2742_v33  ;;  %v1426_v19 = vmul.f32 %v1362_v54, %v3717_v43 }
 0x1f9   : > { %v1209_v63 = vadd.f32 2.0, %v1145_v30  ;;  %v1395_v42 = vmul.f32 %v1331_v60, %v3761_v41 }
 0x1fa   : > { %v2744_v29 = vpop.eup %2743  ;;  %2253 = vst [vmem:[%s3366_s24 + $0xe8] sm:$0xff] %v2213_v58   ;;  %v1177_v39 = vmul.f32 %v2742_v33, %v1113_v4 }
 0x1fb   : > { %v2746_v9 = vpop.eup %2745  ;;  %v1363_v28 = vmul.f32 %v2744_v29, %v1171_v2  ;;  %2753 = vrcp.f32 %v1209_v63  ;;  %v2128_v21 = vpack.c.bf16 %v1395_v42, %v1394_v8 }
 0x1fc   : > { %v2748_v3 = vpop.eup %2747  ;;  %v1079_v53 = vadd.f32 2.0, %v2746_v9  ;;  %2755 = vrcp.f32 %v1206_v0  ;;  %v1241_v51 = vadd.f32 2.0, %v1177_v39 }
 0x1fd   : > { %v1427_v31 = vmul.f32 %v1363_v28, %v3776_v46  ;;  %v1111_v12 = vadd.f32 2.0, %v2748_v3  ;;  %2236 = vst [vmem:[%s3366_s24 + $0x60] sm:$0xff] %v2128_v21   ;;  %2757 = vrcp.f32 %v1238_v45 }
 0x1fe   : > { %v1143_v41 = vmul.f32 %v2746_v9, %v1079_v53  ;;  %2759 = vrcp.f32 %v1241_v51  ;;  %v2750_v7 = vpop.eup %2749 }
 0x1ff   : > { %v2208_v56 = vpack.c.bf16 %v1427_v31, %v1426_v19  ;;  %v1175_v5 = vmul.f32 %v2748_v3, %v1111_v12  ;;  %v2752_v43 = vpop.eup %2751  ;;  %v1336_v48 = vmul.f32 %v2750_v7, %v3853_v23 }
 0x200   : > { %v1207_v2 = vadd.f32 2.0, %v1143_v41  ;;  %v1368_v47 = vmul.f32 %v2752_v43, %v3858_v34 }
 0x201   : > { %2252 = vst [vmem:[%s3366_s24 + $0xe0] sm:$0xff] %v2208_v56   ;;  %v1239_v10 = vadd.f32 2.0, %v1175_v5  ;;  %v1400_v62 = vmul.f32 %v1336_v48, %v3797_v49 }
 0x202   : > { %2761 = vrcp.f32 %v1207_v2  ;;  %v1432_v23 = vmul.f32 %v1368_v47, %v3803_v35 }
 0x203   : > { %2763 = vrcp.f32 %v1239_v10 }
 0x205   : > { %v2754_v46 = vpop.eup %2753 }
 0x206   : > { %v1337_v20 = vmul.f32 %v2754_v46, %v1145_v30  ;;  %v2756_v44 = vpop.eup %2755 }
 0x207   : > { %v2758_v50 = vpop.eup %2757  ;;  %v1334_v38 = vmul.f32 %v2756_v44, %v1142_v36 }
 0x208   : > { %v1401_v14 = vmul.f32 %v1337_v20, %v3824_v16  ;;  %v2760_v1 = vpop.eup %2759  ;;  %v1366_v11 = vmul.f32 %v2758_v50, %v1174_v25 }
 0x209   : > { %v1369_v17 = vmul.f32 %v2760_v1, %v1177_v39  ;;  %v1398_v16 = vmul.f32 %v1334_v38, %v3808_v37 }
 0x20a   : > { %v2143_v59 = vpack.c.bf16 %v1401_v14, %v1400_v62  ;;  %v1430_v35 = vmul.f32 %v1366_v11, %v3820_v6 }
 0x20b   : > { %v1433_v26 = vmul.f32 %v1369_v17, %v3837_v13 }
 0x20c   : > { %v2762_v15 = vpop.eup %2761  ;;  %2239 = vst [vmem:[%s3366_s24 + $0x78] sm:$0xff] %v2143_v59  }
 0x20d   : > { %v2764_v49 = vpop.eup %2763  ;;  %v1335_v57 = vmul.f32 %v2762_v15, %v1143_v41  ;;  %v2223_v34 = vpack.c.bf16 %v1433_v26, %v1432_v23 }
 0x20e   : > { %v1367_v27 = vmul.f32 %v2764_v49, %v1175_v5 }
 0x20f   : > { %v1399_v24 = vmul.f32 %v1335_v57, %v3843_v55  ;;  %2255 = vst [vmem:[%s3366_s24 + $0xf8] sm:$0xff] %v2223_v34  }
 0x210   : > { %v1431_v36 = vmul.f32 %v1367_v27, %v3847_v22 }
 0x211   : > { %v2138_v13 = vpack.c.bf16 %v1399_v24, %v1398_v16 }
 0x212   : > { %v2218_v61 = vpack.c.bf16 %v1431_v36, %v1430_v35 }
 0x213   : > { %2238 = vst [vmem:[%s3366_s24 + $0x70] sm:$0xff] %v2138_v13  }
 0x214   : > { %2254 = vst [vmem:[%s3366_s24 + $0xf0] sm:$0xff] %v2218_v61  }
 0x215   : > { %2837 = shalt.err (!%p2834_p5)
}
 0x216   : > { %s2838_s7 = scalar_lea.hbm %s3891_s26, 4096  ;;  %s2842_s22 = scalar_lea.hbm %s3946_s3, 16384 }
 0x217   : > { %p2839_p9 = scmp.ne.s32.totalorder %s3891_s26, %s2838_s7  ;;  %p2843_p3 = scmp.lt.u32.totalorder %s3891_s26, %s3946_s3 }
 0x218   : > { %p2844_p7 = scmp.lt.u32.totalorder %s2842_s22, %s2838_s7  ;;  %p2846_p4 = scmp.lt.u32.totalorder %s2838_s7, %s3891_s26 }
 0x219   : > { %p2840_p1 = pnand %p2839_p9, %p3037_p11 }
 0x21a   : > { %p2845_p13 = por %p2844_p7, %p2843_p3 }
 0x21b   : > { %p2841_p2 = pneg %p2840_p1 }
 0x21c   : > { %p2847_p6 = por %p2846_p4, %p2845_p13 }
 0x21e   : > { %p2848_p8 = pnand %p2847_p6, %p2841_p2 }
 0x220   : > { %2851 = shalt.err (!%p2848_p8)
}
 0x221   : > { %s2917_s11 = smov 64   ;;  %s2918_s9 = smov 4  }
 0x222   : > { %2398 = dma.vmem_to_hbm [thread:$0]  (%p3037_p11), %s3893_s18, 4096, %s3891_s26, %s1755_s15, %s2917_s11, %s2917_s11, %s2918_s9  }
 0x223 PF: > { %p2415_p12 = scmp.ge.s32.totalorder %s2910_s17, 2  ;;  %s1784_s25 = sand.u32 1, %s2890_s12  }
 0x224   : > { %p4002_p10 = scmp.ne.s32.totalorder %s3955_s23, 0  ;;  %s1785_s8 = scalar_lea.sflag [#allocation4], %s1784_s25 }
 0x226   : > { %p2409_p0 = pnand %p2415_p12, %p4002_p10 }
 0x228   : > { %2885 = dma.done.wait (!%p2409_p0), %s1785_s8, 4096  }
 0x229   : > { %2887 = vsyncadd (!%p2409_p0), %s1785_s8, 4294963200  ;;  %s20_s17 = sadd.s32 1, %s2910_s17   ;;  %s4003_s12 = smov %s2894_s13 }
 0x22a   : > { %p17_p5 = scmp.ge.s32.totalorder %s20_s17, 6   ;;  %s4004_s13 = smov %s2898_s14 }
 0x22b   : > { %s4005_s14 = smov %s3046_s5  ;;  %s4006_s15 = smov %s2906_s16 }
 0x22c   : > { %s4007_s16 = smov %s4009_s28  ;;  %19 = sbr.rel (!%p17_p5) target bundleno = 7 (0x7), region = 85 }
 0x233   :  { %1790 = vsyncpa [#allocation3], 1 }
 0x234   :  { %1792 = vsyncpa [#allocation3 + $0x1], 1 }
 0x235   :  { %1793 = vsyncpa [#allocation6], 1 }
 0x236   :  { %1794 = vsyncpa [#allocation4], 1 }
 0x237   :  { %1796 = vsyncpa [#allocation4 + $0x1], 1 }

</bundles_post_ra>
